<compile_context>
chip_gen: v7x
topology: tpu7x:2x2x1
jax: 0.10.0
libtpu: 0.0.40
codegen_flags: <defaults>
</compile_context>

<pallas_src>
import functools
import math

import jax
import jax.numpy as jnp
from jax.experimental import pallas as pl
from jax.experimental.pallas import tpu as pltpu

_VMEM_LIMIT = 32 * 1024 * 1024


# ----------------------------------------------------------------------------
# Kernels
# ----------------------------------------------------------------------------
def _spmm_kernel(a_ref, x_ref, o_ref, acc_ref):
    """One (dst-tile, src-tile) step of A_hat @ X with f32 accumulation."""
    @pl.when(pl.program_id(1) == 0)
    def _():
        acc_ref[...] = jnp.zeros_like(acc_ref)

    acc_ref[...] += jnp.dot(a_ref[...], x_ref[...],
                            preferred_element_type=jnp.float32)

    @pl.when(pl.program_id(1) == pl.num_programs(1) - 1)
    def _():
        o_ref[...] = acc_ref[...].astype(o_ref.dtype)


def _combine_mlp_kernel(*refs, K1, n_mlp):
    """out = ReLU(concat(x_0..x_K) @ W_stack + b), then n_mlp fused Linear+ReLU.

    refs = (x_0 .. x_K, w_stack[(K+1)F, F], b[1, F],
            (w_i[F, F], b_i[1, F]) * n_mlp, o_ref[tm, F])
    """
    xs = [refs[i][...] for i in range(K1)]
    w_stack = refs[K1][...]
    b_conv = refs[K1 + 1][...]
    mlp_refs = refs[K1 + 2: K1 + 2 + 2 * n_mlp]
    o_ref = refs[-1]

    xw = xs[0] if K1 == 1 else jnp.concatenate(xs, axis=-1)      # [tm, K1*F] bf16
    h = jnp.dot(xw, w_stack, preferred_element_type=jnp.float32) + b_conv
    h = jnp.maximum(h, 0.0)                                       # conv bias + outer ReLU

    for i in range(n_mlp):                                        # fused Linear+ReLU chain
        w = mlp_refs[2 * i][...]
        b = mlp_refs[2 * i + 1][...]
        h = jnp.dot(h.astype(w.dtype), w, preferred_element_type=jnp.float32) + b
        h = jnp.maximum(h, 0.0)

    o_ref[...] = h.astype(o_ref.dtype)


# ----------------------------------------------------------------------------
# Wrappers (pallas_call plumbing)
# ----------------------------------------------------------------------------
def spmm(a, x, *, tile_m=128, tile_k=128):
    """y = a @ x, a:[N,N] bf16, x:[N,F] bf16 -> y:[N,F] bf16 (f32 accumulation)."""
    n = a.shape[0]
    f = x.shape[1]
    return pl.pallas_call(
        _spmm_kernel,
        out_shape=jax.ShapeDtypeStruct((n, f), x.dtype),
        grid_spec=pltpu.PrefetchScalarGridSpec(
            num_scalar_prefetch=0,
            grid=(n // tile_m, n // tile_k),
            in_specs=[
                pl.BlockSpec((tile_m, tile_k), lambda i, k: (i, k)),
                pl.BlockSpec((tile_k, f), lambda i, k: (k, 0)),
            ],
            out_specs=pl.BlockSpec((tile_m, f), lambda i, k: (i, 0)),
            scratch_shapes=[pltpu.VMEM((tile_m, f), jnp.float32)],
        ),
        compiler_params=pltpu.CompilerParams(
            dimension_semantics=("parallel", "arbitrary"),
            vmem_limit_bytes=_VMEM_LIMIT,
        ),
        cost_estimate=pl.CostEstimate(
            flops=2 * n * n * f,
            transcendentals=0,
            bytes_accessed=a.size * a.dtype.itemsize + 2 * x.size * x.dtype.itemsize,
        ),
    )(a, x)


def combine_mlp(xs, w_stack, b_conv, mlp_params, *, out_dtype, tile_m=128):
    """Fused: ReLU(sum_k xs[k] @ W_k + b) followed by fused Linear+ReLU layers."""
    n, f = xs[0].shape
    k1 = len(xs)
    n_mlp = len(mlp_params)

    in_specs = [pl.BlockSpec((tile_m, f), lambda i: (i, 0)) for _ in range(k1)]
    in_specs += [
        pl.BlockSpec(w_stack.shape, lambda i: (0, 0)),
        pl.BlockSpec(b_conv.shape, lambda i: (0, 0)),
    ]
    args = list(xs) + [w_stack, b_conv]
    for (w, b) in mlp_params:
        in_specs += [
            pl.BlockSpec(w.shape, lambda i: (0, 0)),
            pl.BlockSpec(b.shape, lambda i: (0, 0)),
        ]
        args += [w, b]

    kernel = functools.partial(_combine_mlp_kernel, K1=k1, n_mlp=n_mlp)
    return pl.pallas_call(
        kernel,
        out_shape=jax.ShapeDtypeStruct((n, f), out_dtype),
        grid_spec=pltpu.PrefetchScalarGridSpec(
            num_scalar_prefetch=0,
            grid=(n // tile_m,),
            in_specs=in_specs,
            out_specs=pl.BlockSpec((tile_m, f), lambda i: (i, 0)),
        ),
        compiler_params=pltpu.CompilerParams(
            dimension_semantics=("parallel",),
            vmem_limit_bytes=_VMEM_LIMIT,
        ),
        cost_estimate=pl.CostEstimate(
            flops=2 * n * f * f * (k1 + n_mlp),
            transcendentals=0,
            bytes_accessed=(k1 + 1) * n * f * 2,
        ),
    )(*args)


# ----------------------------------------------------------------------------
# Graph normalization (PyG gcn_norm, add_self_loops=False, edge_weight=1)
# ----------------------------------------------------------------------------
def build_a_hat(edge_index, num_nodes):
    row, col = edge_index[0], edge_index[1]
    ones = jnp.ones(row.shape, jnp.float32)
    deg = jnp.zeros((num_nodes,), jnp.float32).at[col].add(ones)
    dis = jnp.where(deg > 0, jax.lax.rsqrt(jnp.maximum(deg, 1e-12)), 0.0)
    norm = dis[row] * dis[col]
    # aggregation at destination (col): A_hat[dst, src]
    return jnp.zeros((num_nodes, num_nodes), jnp.float32).at[col, row].add(norm)


def _round_up(v, m):
    return ((v + m - 1) // m) * m


# ----------------------------------------------------------------------------
# Parameters & forward
# ----------------------------------------------------------------------------
def init_params(key, node_features, num_filters=128, K=3):
    ks = iter(jax.random.split(key, 16))

    def nrm(shape, scale=0.1):
        return scale * jax.random.normal(next(ks), shape, jnp.float32)

    return {
        "lin0_w": nrm((node_features, num_filters)), "lin0_b": nrm((num_filters,)),
        "conv1_w": nrm((K + 1, num_filters, num_filters)), "conv1_b": nrm((num_filters,)),
        "conv2_w": nrm((K + 1, num_filters, num_filters)), "conv2_b": nrm((num_filters,)),
        "lin1_w": nrm((num_filters, num_filters)), "lin1_b": nrm((num_filters,)),
        "lin2_w": nrm((num_filters, num_filters)), "lin2_b": nrm((num_filters,)),
        "lin3_w": nrm((num_filters, 1)), "lin3_b": nrm((1,)),
    }


def forward(params, x, edge_index, *, tile_m=128, tile_k=128):
    f = params["lin0_w"].shape[1]                     # num_filters (128)
    K = params["conv1_w"].shape[0] - 1
    n = x.shape[0]
    n_pad = _round_up(n, math.lcm(tile_m, tile_k))

    # Dense normalized adjacency, zero-padded, bf16 for the MXU.
    a = build_a_hat(edge_index, n)
    a = jnp.pad(a, ((0, n_pad - n), (0, n_pad - n))).astype(jnp.bfloat16)

    # Pad node features to a full lane width (4 -> 128) and nodes to tile multiple.
    f_in = x.shape[1]
    f_in_pad = _round_up(max(f_in, 128), 128)
    x_p = jnp.pad(x.astype(jnp.float32),
                  ((0, n_pad - n), (0, f_in_pad - f_in))).astype(jnp.bfloat16)

    # --- lin0: Linear + ReLU (combine kernel with K1=1, no extra MLP) ---------
    w0 = jnp.pad(params["lin0_w"], ((0, f_in_pad - f_in), (0, 0))).astype(jnp.bfloat16)
    b0 = params["lin0_b"].reshape(1, -1)
    h = combine_mlp([x_p], w0, b0, [], out_dtype=jnp.bfloat16, tile_m=tile_m)

    # --- conv1 + F.relu -------------------------------------------------------
    xs = [h]
    for _ in range(K):
        xs.append(spmm(a, xs[-1], tile_m=tile_m, tile_k=tile_k))
    w1 = params["conv1_w"].reshape(-1, f).astype(jnp.bfloat16)   # [(K+1)F, F]
    b1 = params["conv1_b"].reshape(1, -1)
    h = combine_mlp(xs, w1, b1, [], out_dtype=jnp.bfloat16, tile_m=tile_m)

    # --- conv2 + F.relu, fused with lin1 -> lin2 -> lin3 (lin3 padded to 128) --
    xs = [h]
    for _ in range(K):
        xs.append(spmm(a, xs[-1], tile_m=tile_m, tile_k=tile_k))
    w2 = params["conv2_w"].reshape(-1, f).astype(jnp.bfloat16)
    b2 = params["conv2_b"].reshape(1, -1)

    w3p = jnp.pad(params["lin3_w"], ((0, 0), (0, f - params["lin3_w"].shape[1])))
    b3p = jnp.pad(params["lin3_b"], ((0, f - params["lin3_b"].shape[0]),))
    mlp = [
        (params["lin1_w"].astype(jnp.bfloat16), params["lin1_b"].reshape(1, -1)),
        (params["lin2_w"].astype(jnp.bfloat16), params["lin2_b"].reshape(1, -1)),
        (w3p.astype(jnp.bfloat16), b3p.reshape(1, -1)),
    ]
    out = combine_mlp(xs, w2, b2, mlp, out_dtype=jnp.float32, tile_m=tile_m)

    return out[:n, :1]                                 # drop node / lane padding


if __name__ == "__main__":
    key = jax.random.PRNGKey(0)
    k_x, k_e, k_p = jax.random.split(key, 3)

    node_features, num_filters, K = 4, 128, 3
    N, E = 256, 1024                                   # small, but exercises tiling (grid 2x2)

    x = jax.random.normal(k_x, (N, node_features), jnp.float32)
    edge_index = jax.random.randint(k_e, (2, E), 0, N, jnp.int32)

    params = init_params(k_p, node_features, num_filters=num_filters, K=K)

    fwd = jax.jit(forward)
    out = fwd(params, x, edge_index)
    out = jax.block_until_ready(out)

    assert out.shape == (N, 1)
    assert bool(jnp.all(jnp.isfinite(out)))
    assert bool(jnp.all(out >= 0.0))                   # final layer ends in ReLU
    print("KERNEL_OK")
</pallas_src>

<mosaic_0001>
module attributes {stable_mosaic.version = 11 : i64} {
  func.func private @main(%arg0: i32) attributes {dimension_semantics = [#tpu.dimension_semantics<core_parallel>], iteration_bounds = array<i64: 2>, tpu.core_type = #tpu.core_type<sc_scalar_subcore>, window_params = []} {
    return
  }
}

module attributes {stable_mosaic.version = 11 : i64} {
  func.func private @main(%arg0: i32) attributes {dimension_semantics = [#tpu.dimension_semantics<core_parallel>], iteration_bounds = array<i64: 2>, tpu.core_type = #tpu.core_type<sc_scalar_subcore>, window_params = []} {
    return
  }
}

module attributes {stable_mosaic.version = 11 : i64} {
  func.func @_combine_mlp_kernel(%arg0: i32, %arg1: memref<128x128xbf16, #tpu.memory_space<vmem>>, %arg2: memref<128x128xbf16, #tpu.memory_space<vmem>>, %arg3: memref<1x128xf32, #tpu.memory_space<vmem>>, %arg4: memref<128x128xbf16, #tpu.memory_space<vmem>>) attributes {dimension_semantics = [#tpu.dimension_semantics<parallel>], iteration_bounds = array<i64: 2>, scalar_prefetch = 0 : i64, scratch_operands = 0 : i64, tpu.core_type = #tpu.core_type<tc>, window_params = [{transform_indices = @transform_0, window_bounds = array<i64: 128, 128>}, {pipeline_mode = #tpu.pipeline_mode<synchronous>, transform_indices = @transform_1, window_bounds = array<i64: 128, 128>}, {pipeline_mode = #tpu.pipeline_mode<synchronous>, transform_indices = @transform_2, window_bounds = array<i64: 1, 128>}, {transform_indices = @transform_3, window_bounds = array<i64: 128, 128>}]} {
    %c0 = arith.constant 0 : index
    %c0_0 = arith.constant 0 : index
    %0 = vector.load %arg1[%c0, %c0_0] : memref<128x128xbf16, #tpu.memory_space<vmem>>, vector<128x128xbf16>
    %c0_1 = arith.constant 0 : index
    %c0_2 = arith.constant 0 : index
    %1 = vector.load %arg2[%c0_1, %c0_2] : memref<128x128xbf16, #tpu.memory_space<vmem>>, vector<128x128xbf16>
    %c0_3 = arith.constant 0 : index
    %c0_4 = arith.constant 0 : index
    %2 = vector.load %arg3[%c0_3, %c0_4] : memref<1x128xf32, #tpu.memory_space<vmem>>, vector<1x128xf32>
    %cst = arith.constant dense<0.000000e+00> : vector<128x128xf32>
    %3 = tpu.matmul %0, %1, %cst {dimension_numbers = #tpu.dot_dimension_numbers<[1], [0], [0], [1], [0, 0, 1, 1], [], []>} : vector<128x128xbf16>, vector<128x128xbf16>, vector<128x128xf32> -> vector<128x128xf32>
    %4 = vector.broadcast %2 : vector<1x128xf32> to vector<128x128xf32>
    %5 = arith.addf %3, %4 : vector<128x128xf32>
    %cst_5 = arith.constant 0.000000e+00 : f32
    %6 = vector.broadcast %cst_5 : f32 to vector<128x128xf32>
    %7 = arith.maximumf %5, %6 : vector<128x128xf32>
    %8 = arith.truncf %7 : vector<128x128xf32> to vector<128x128xbf16>
    %c0_6 = arith.constant 0 : index
    %c0_7 = arith.constant 0 : index
    %9 = vector.load %arg4[%c0_6, %c0_7] : memref<128x128xbf16, #tpu.memory_space<vmem>>, vector<128x128xbf16>
    tpu.vector_store %arg4[%c0_6, %c0_7], %8 {strides = array<i32>} : memref<128x128xbf16, #tpu.memory_space<vmem>>, vector<128x128xbf16>,
    return
  }
  func.func @transform_0(%arg0: i32) -> (i32, i32) {
    %c0_i32 = arith.constant 0 : i32
    %c0_i32_0 = arith.constant 0 : i32
    return %arg0, %c0_i32 : i32, i32
  }
  func.func @transform_1(%arg0: i32) -> (i32, i32) {
    %c0_i32 = arith.constant 0 : i32
    %c0_i32_0 = arith.constant 0 : i32
    %c0_i32_1 = arith.constant 0 : i32
    return %c0_i32, %c0_i32_0 : i32, i32
  }
  func.func @transform_2(%arg0: i32) -> (i32, i32) {
    %c0_i32 = arith.constant 0 : i32
    %c0_i32_0 = arith.constant 0 : i32
    %c0_i32_1 = arith.constant 0 : i32
    return %c0_i32, %c0_i32_0 : i32, i32
  }
  func.func @transform_3(%arg0: i32) -> (i32, i32) {
    %c0_i32 = arith.constant 0 : i32
    %c0_i32_0 = arith.constant 0 : i32
    return %arg0, %c0_i32 : i32, i32
  }
}

module attributes {stable_mosaic.version = 11 : i64} {
  func.func @_spmm_kernel(%arg0: i32, %arg1: i32, %arg2: memref<128x128xbf16, #tpu.memory_space<vmem>>, %arg3: memref<128x128xbf16, #tpu.memory_space<vmem>>, %arg4: memref<128x128xbf16, #tpu.memory_space<vmem>>, %arg5: memref<128x128xf32, #tpu.memory_space<vmem>>) attributes {dimension_semantics = [#tpu.dimension_semantics<parallel>, #tpu.dimension_semantics<arbitrary>], iteration_bounds = array<i64: 2, 2>, scalar_prefetch = 0 : i64, scratch_operands = 1 : i64, tpu.core_type = #tpu.core_type<tc>, window_params = [{transform_indices = @transform_0, window_bounds = array<i64: 128, 128>}, {transform_indices = @transform_1, window_bounds = array<i64: 128, 128>}, {transform_indices = @transform_2, window_bounds = array<i64: 128, 128>}]} {
    %c0_i32 = arith.constant 0 : i32
    %0 = arith.cmpi eq, %arg1, %c0_i32 : i32
    %1 = arith.extui %0 : i1 to i32
    %c0_i32_0 = arith.constant 0 : i32
    %2 = arith.cmpi ne, %1, %c0_i32_0 : i32
    scf.if %2 {
      %cst_9 = arith.constant 0.000000e+00 : f32
      %12 = vector.broadcast %cst_9 : f32 to vector<128x128xf32>
      %c0_10 = arith.constant 0 : index
      %c0_11 = arith.constant 0 : index
      %13 = vector.load %arg5[%c0_10, %c0_11] : memref<128x128xf32, #tpu.memory_space<vmem>>, vector<128x128xf32>
      tpu.vector_store %arg5[%c0_10, %c0_11], %12 {strides = array<i32>} : memref<128x128xf32, #tpu.memory_space<vmem>>, vector<128x128xf32>,
    } else {
    }
    %c0 = arith.constant 0 : index
    %c0_1 = arith.constant 0 : index
    %3 = vector.load %arg5[%c0, %c0_1] : memref<128x128xf32, #tpu.memory_space<vmem>>, vector<128x128xf32>
    %c0_2 = arith.constant 0 : index
    %c0_3 = arith.constant 0 : index
    %4 = vector.load %arg2[%c0_2, %c0_3] : memref<128x128xbf16, #tpu.memory_space<vmem>>, vector<128x128xbf16>
    %c0_4 = arith.constant 0 : index
    %c0_5 = arith.constant 0 : index
    %5 = vector.load %arg3[%c0_4, %c0_5] : memref<128x128xbf16, #tpu.memory_space<vmem>>, vector<128x128xbf16>
    %cst = arith.constant dense<0.000000e+00> : vector<128x128xf32>
    %6 = tpu.matmul %4, %5, %cst {dimension_numbers = #tpu.dot_dimension_numbers<[1], [0], [0], [1], [0, 0, 1, 1], [], []>} : vector<128x128xbf16>, vector<128x128xbf16>, vector<128x128xf32> -> vector<128x128xf32>
    %7 = arith.addf %3, %6 : vector<128x128xf32>
    %c0_6 = arith.constant 0 : index
    %c0_7 = arith.constant 0 : index
    %8 = vector.load %arg5[%c0_6, %c0_7] : memref<128x128xf32, #tpu.memory_space<vmem>>, vector<128x128xf32>
    tpu.vector_store %arg5[%c0_6, %c0_7], %7 {strides = array<i32>} : memref<128x128xf32, #tpu.memory_space<vmem>>, vector<128x128xf32>,
    %c1_i32 = arith.constant 1 : i32
    %9 = arith.cmpi eq, %arg1, %c1_i32 : i32
    %10 = arith.extui %9 : i1 to i32
    %c0_i32_8 = arith.constant 0 : i32
    %11 = arith.cmpi ne, %10, %c0_i32_8 : i32
    scf.if %11 {
      %c0_9 = arith.constant 0 : index
      %c0_10 = arith.constant 0 : index
      %12 = vector.load %arg5[%c0_9, %c0_10] : memref<128x128xf32, #tpu.memory_space<vmem>>, vector<128x128xf32>
      %13 = arith.truncf %12 : vector<128x128xf32> to vector<128x128xbf16>
      %c0_11 = arith.constant 0 : index
      %c0_12 = arith.constant 0 : index
      %14 = vector.load %arg4[%c0_11, %c0_12] : memref<128x128xbf16, #tpu.memory_space<vmem>>, vector<128x128xbf16>
      tpu.vector_store %arg4[%c0_11, %c0_12], %13 {strides = array<i32>} : memref<128x128xbf16, #tpu.memory_space<vmem>>, vector<128x128xbf16>,
    } else {
    }
    return
  }
  func.func @transform_0(%arg0: i32, %arg1: i32) -> (i32, i32) {
    %c0_i32 = arith.constant 0 : i32
    return %arg0, %arg1 : i32, i32
  }
  func.func @transform_1(%arg0: i32, %arg1: i32) -> (i32, i32) {
    %c0_i32 = arith.constant 0 : i32
    %c0_i32_0 = arith.constant 0 : i32
    return %arg1, %c0_i32 : i32, i32
  }
  func.func @transform_2(%arg0: i32, %arg1: i32) -> (i32, i32) {
    %c0_i32 = arith.constant 0 : i32
    %c0_i32_0 = arith.constant 0 : i32
    return %arg0, %c0_i32 : i32, i32
  }
}

module attributes {stable_mosaic.version = 11 : i64} {
  func.func @_combine_mlp_kernel(%arg0: i32, %arg1: memref<128x128xbf16, #tpu.memory_space<vmem>>, %arg2: memref<128x128xbf16, #tpu.memory_space<vmem>>, %arg3: memref<128x128xbf16, #tpu.memory_space<vmem>>, %arg4: memref<128x128xbf16, #tpu.memory_space<vmem>>, %arg5: memref<512x128xbf16, #tpu.memory_space<vmem>>, %arg6: memref<1x128xf32, #tpu.memory_space<vmem>>, %arg7: memref<128x128xbf16, #tpu.memory_space<vmem>>) attributes {dimension_semantics = [#tpu.dimension_semantics<parallel>], iteration_bounds = array<i64: 2>, scalar_prefetch = 0 : i64, scratch_operands = 0 : i64, tpu.core_type = #tpu.core_type<tc>, window_params = [{transform_indices = @transform_0, window_bounds = array<i64: 128, 128>}, {transform_indices = @transform_1, window_bounds = array<i64: 128, 128>}, {transform_indices = @transform_2, window_bounds = array<i64: 128, 128>}, {transform_indices = @transform_3, window_bounds = array<i64: 128, 128>}, {pipeline_mode = #tpu.pipeline_mode<synchronous>, transform_indices = @transform_4, window_bounds = array<i64: 512, 128>}, {pipeline_mode = #tpu.pipeline_mode<synchronous>, transform_indices = @transform_5, window_bounds = array<i64: 1, 128>}, {transform_indices = @transform_6, window_bounds = array<i64: 128, 128>}]} {
    %c0 = arith.constant 0 : index
    %c0_0 = arith.constant 0 : index
    %0 = vector.load %arg1[%c0, %c0_0] : memref<128x128xbf16, #tpu.memory_space<vmem>>, vector<128x128xbf16>
    %c0_1 = arith.constant 0 : index
    %c0_2 = arith.constant 0 : index
    %1 = vector.load %arg2[%c0_1, %c0_2] : memref<128x128xbf16, #tpu.memory_space<vmem>>, vector<128x128xbf16>
    %c0_3 = arith.constant 0 : index
    %c0_4 = arith.constant 0 : index
    %2 = vector.load %arg3[%c0_3, %c0_4] : memref<128x128xbf16, #tpu.memory_space<vmem>>, vector<128x128xbf16>
    %c0_5 = arith.constant 0 : index
    %c0_6 = arith.constant 0 : index
    %3 = vector.load %arg4[%c0_5, %c0_6] : memref<128x128xbf16, #tpu.memory_space<vmem>>, vector<128x128xbf16>
    %c0_7 = arith.constant 0 : index
    %c0_8 = arith.constant 0 : index
    %4 = vector.load %arg5[%c0_7, %c0_8] : memref<512x128xbf16, #tpu.memory_space<vmem>>, vector<512x128xbf16>
    %c0_9 = arith.constant 0 : index
    %c0_10 = arith.constant 0 : index
    %5 = vector.load %arg6[%c0_9, %c0_10] : memref<1x128xf32, #tpu.memory_space<vmem>>, vector<1x128xf32>
    %6 = tpu.concatenate %0, %1, %2, %3 in 1 : vector<128x128xbf16>, vector<128x128xbf16>, vector<128x128xbf16>, vector<128x128xbf16> -> vector<128x512xbf16>
    %cst = arith.constant dense<0.000000e+00> : vector<128x128xf32>
    %7 = tpu.matmul %6, %4, %cst {dimension_numbers = #tpu.dot_dimension_numbers<[1], [0], [0], [1], [0, 0, 1, 1], [], []>} : vector<128x512xbf16>, vector<512x128xbf16>, vector<128x128xf32> -> vector<128x128xf32>
    %8 = vector.broadcast %5 : vector<1x128xf32> to vector<128x128xf32>
    %9 = arith.addf %7, %8 : vector<128x128xf32>
    %cst_11 = arith.constant 0.000000e+00 : f32
    %10 = vector.broadcast %cst_11 : f32 to vector<128x128xf32>
    %11 = arith.maximumf %9, %10 : vector<128x128xf32>
    %12 = arith.truncf %11 : vector<128x128xf32> to vector<128x128xbf16>
    %c0_12 = arith.constant 0 : index
    %c0_13 = arith.constant 0 : index
    %13 = vector.load %arg7[%c0_12, %c0_13] : memref<128x128xbf16, #tpu.memory_space<vmem>>, vector<128x128xbf16>
    tpu.vector_store %arg7[%c0_12, %c0_13], %12 {strides = array<i32>} : memref<128x128xbf16, #tpu.memory_space<vmem>>, vector<128x128xbf16>,
    return
  }
  func.func @transform_0(%arg0: i32) -> (i32, i32) {
    %c0_i32 = arith.constant 0 : i32
    %c0_i32_0 = arith.constant 0 : i32
    return %arg0, %c0_i32 : i32, i32
  }
  func.func @transform_1(%arg0: i32) -> (i32, i32) {
    %c0_i32 = arith.constant 0 : i32
    %c0_i32_0 = arith.constant 0 : i32
    return %arg0, %c0_i32 : i32, i32
  }
  func.func @transform_2(%arg0: i32) -> (i32, i32) {
    %c0_i32 = arith.constant 0 : i32
    %c0_i32_0 = arith.constant 0 : i32
    return %arg0, %c0_i32 : i32, i32
  }
  func.func @transform_3(%arg0: i32) -> (i32, i32) {
    %c0_i32 = arith.constant 0 : i32
    %c0_i32_0 = arith.constant 0 : i32
    return %arg0, %c0_i32 : i32, i32
  }
  func.func @transform_4(%arg0: i32) -> (i32, i32) {
    %c0_i32 = arith.constant 0 : i32
    %c0_i32_0 = arith.constant 0 : i32
    %c0_i32_1 = arith.constant 0 : i32
    return %c0_i32, %c0_i32_0 : i32, i32
  }
  func.func @transform_5(%arg0: i32) -> (i32, i32) {
    %c0_i32 = arith.constant 0 : i32
    %c0_i32_0 = arith.constant 0 : i32
    %c0_i32_1 = arith.constant 0 : i32
    return %c0_i32, %c0_i32_0 : i32, i32
  }
  func.func @transform_6(%arg0: i32) -> (i32, i32) {
    %c0_i32 = arith.constant 0 : i32
    %c0_i32_0 = arith.constant 0 : i32
    return %arg0, %c0_i32 : i32, i32
  }
}

module attributes {stable_mosaic.version = 11 : i64} {
  func.func @_combine_mlp_kernel(%arg0: i32, %arg1: memref<128x128xbf16, #tpu.memory_space<vmem>>, %arg2: memref<128x128xbf16, #tpu.memory_space<vmem>>, %arg3: memref<128x128xbf16, #tpu.memory_space<vmem>>, %arg4: memref<128x128xbf16, #tpu.memory_space<vmem>>, %arg5: memref<512x128xbf16, #tpu.memory_space<vmem>>, %arg6: memref<1x128xf32, #tpu.memory_space<vmem>>, %arg7: memref<128x128xbf16, #tpu.memory_space<vmem>>, %arg8: memref<1x128xf32, #tpu.memory_space<vmem>>, %arg9: memref<128x128xbf16, #tpu.memory_space<vmem>>, %arg10: memref<1x128xf32, #tpu.memory_space<vmem>>, %arg11: memref<128x128xbf16, #tpu.memory_space<vmem>>, %arg12: memref<1x128xf32, #tpu.memory_space<vmem>>, %arg13: memref<128x128xf32, #tpu.memory_space<vmem>>) attributes {dimension_semantics = [#tpu.dimension_semantics<parallel>], iteration_bounds = array<i64: 2>, scalar_prefetch = 0 : i64, scratch_operands = 0 : i64, tpu.core_type = #tpu.core_type<tc>, window_params = [{transform_indices = @transform_0, window_bounds = array<i64: 128, 128>}, {transform_indices = @transform_1, window_bounds = array<i64: 128, 128>}, {transform_indices = @transform_2, window_bounds = array<i64: 128, 128>}, {transform_indices = @transform_3, window_bounds = array<i64: 128, 128>}, {pipeline_mode = #tpu.pipeline_mode<synchronous>, transform_indices = @transform_4, window_bounds = array<i64: 512, 128>}, {pipeline_mode = #tpu.pipeline_mode<synchronous>, transform_indices = @transform_5, window_bounds = array<i64: 1, 128>}, {pipeline_mode = #tpu.pipeline_mode<synchronous>, transform_indices = @transform_6, window_bounds = array<i64: 128, 128>}, {pipeline_mode = #tpu.pipeline_mode<synchronous>, transform_indices = @transform_7, window_bounds = array<i64: 1, 128>}, {pipeline_mode = #tpu.pipeline_mode<synchronous>, transform_indices = @transform_8, window_bounds = array<i64: 128, 128>}, {pipeline_mode = #tpu.pipeline_mode<synchronous>, transform_indices = @transform_9, window_bounds = array<i64: 1, 128>}, {pipeline_mode = #tpu.pipeline_mode<synchronous>, transform_indices = @transform_10, window_bounds = array<i64: 128, 128>}, {pipeline_mode = #tpu.pipeline_mode<synchronous>, transform_indices = @transform_11, window_bounds = array<i64: 1, 128>}, {transform_indices = @transform_12, window_bounds = array<i64: 128, 128>}]} {
    %c0 = arith.constant 0 : index
    %c0_0 = arith.constant 0 : index
    %0 = vector.load %arg1[%c0, %c0_0] : memref<128x128xbf16, #tpu.memory_space<vmem>>, vector<128x128xbf16>
    %c0_1 = arith.constant 0 : index
    %c0_2 = arith.constant 0 : index
    %1 = vector.load %arg2[%c0_1, %c0_2] : memref<128x128xbf16, #tpu.memory_space<vmem>>, vector<128x128xbf16>
    %c0_3 = arith.constant 0 : index
    %c0_4 = arith.constant 0 : index
    %2 = vector.load %arg3[%c0_3, %c0_4] : memref<128x128xbf16, #tpu.memory_space<vmem>>, vector<128x128xbf16>
    %c0_5 = arith.constant 0 : index
    %c0_6 = arith.constant 0 : index
    %3 = vector.load %arg4[%c0_5, %c0_6] : memref<128x128xbf16, #tpu.memory_space<vmem>>, vector<128x128xbf16>
    %c0_7 = arith.constant 0 : index
    %c0_8 = arith.constant 0 : index
    %4 = vector.load %arg5[%c0_7, %c0_8] : memref<512x128xbf16, #tpu.memory_space<vmem>>, vector<512x128xbf16>
    %c0_9 = arith.constant 0 : index
    %c0_10 = arith.constant 0 : index
    %5 = vector.load %arg6[%c0_9, %c0_10] : memref<1x128xf32, #tpu.memory_space<vmem>>, vector<1x128xf32>
    %6 = tpu.concatenate %0, %1, %2, %3 in 1 : vector<128x128xbf16>, vector<128x128xbf16>, vector<128x128xbf16>, vector<128x128xbf16> -> vector<128x512xbf16>
    %cst = arith.constant dense<0.000000e+00> : vector<128x128xf32>
    %7 = tpu.matmul %6, %4, %cst {dimension_numbers = #tpu.dot_dimension_numbers<[1], [0], [0], [1], [0, 0, 1, 1], [], []>} : vector<128x512xbf16>, vector<512x128xbf16>, vector<128x128xf32> -> vector<128x128xf32>
    %8 = vector.broadcast %5 : vector<1x128xf32> to vector<128x128xf32>
    %9 = arith.addf %7, %8 : vector<128x128xf32>
    %cst_11 = arith.constant 0.000000e+00 : f32
    %10 = vector.broadcast %cst_11 : f32 to vector<128x128xf32>
    %11 = arith.maximumf %9, %10 : vector<128x128xf32>
    %c0_12 = arith.constant 0 : index
    %c0_13 = arith.constant 0 : index
    %12 = vector.load %arg7[%c0_12, %c0_13] : memref<128x128xbf16, #tpu.memory_space<vmem>>, vector<128x128xbf16>
    %c0_14 = arith.constant 0 : index
    %c0_15 = arith.constant 0 : index
    %13 = vector.load %arg8[%c0_14, %c0_15] : memref<1x128xf32, #tpu.memory_space<vmem>>, vector<1x128xf32>
    %14 = arith.truncf %11 : vector<128x128xf32> to vector<128x128xbf16>
    %cst_16 = arith.constant dense<0.000000e+00> : vector<128x128xf32>
    %15 = tpu.matmul %14, %12, %cst_16 {dimension_numbers = #tpu.dot_dimension_numbers<[1], [0], [0], [1], [0, 0, 1, 1], [], []>} : vector<128x128xbf16>, vector<128x128xbf16>, vector<128x128xf32> -> vector<128x128xf32>
    %16 = vector.broadcast %13 : vector<1x128xf32> to vector<128x128xf32>
    %17 = arith.addf %15, %16 : vector<128x128xf32>
    %cst_17 = arith.constant 0.000000e+00 : f32
    %18 = vector.broadcast %cst_17 : f32 to vector<128x128xf32>
    %19 = arith.maximumf %17, %18 : vector<128x128xf32>
    %c0_18 = arith.constant 0 : index
    %c0_19 = arith.constant 0 : index
    %20 = vector.load %arg9[%c0_18, %c0_19] : memref<128x128xbf16, #tpu.memory_space<vmem>>, vector<128x128xbf16>
    %c0_20 = arith.constant 0 : index
    %c0_21 = arith.constant 0 : index
    %21 = vector.load %arg10[%c0_20, %c0_21] : memref<1x128xf32, #tpu.memory_space<vmem>>, vector<1x128xf32>
    %22 = arith.truncf %19 : vector<128x128xf32> to vector<128x128xbf16>
    %cst_22 = arith.constant dense<0.000000e+00> : vector<128x128xf32>
    %23 = tpu.matmul %22, %20, %cst_22 {dimension_numbers = #tpu.dot_dimension_numbers<[1], [0], [0], [1], [0, 0, 1, 1], [], []>} : vector<128x128xbf16>, vector<128x128xbf16>, vector<128x128xf32> -> vector<128x128xf32>
    %24 = vector.broadcast %21 : vector<1x128xf32> to vector<128x128xf32>
    %25 = arith.addf %23, %24 : vector<128x128xf32>
    %cst_23 = arith.constant 0.000000e+00 : f32
    %26 = vector.broadcast %cst_23 : f32 to vector<128x128xf32>
    %27 = arith.maximumf %25, %26 : vector<128x128xf32>
    %c0_24 = arith.constant 0 : index
    %c0_25 = arith.constant 0 : index
    %28 = vector.load %arg11[%c0_24, %c0_25] : memref<128x128xbf16, #tpu.memory_space<vmem>>, vector<128x128xbf16>
    %c0_26 = arith.constant 0 : index
    %c0_27 = arith.constant 0 : index
    %29 = vector.load %arg12[%c0_26, %c0_27] : memref<1x128xf32, #tpu.memory_space<vmem>>, vector<1x128xf32>
    %30 = arith.truncf %27 : vector<128x128xf32> to vector<128x128xbf16>
    %cst_28 = arith.constant dense<0.000000e+00> : vector<128x128xf32>
    %31 = tpu.matmul %30, %28, %cst_28 {dimension_numbers = #tpu.dot_dimension_numbers<[1], [0], [0], [1], [0, 0, 1, 1], [], []>} : vector<128x128xbf16>, vector<128x128xbf16>, vector<128x128xf32> -> vector<128x128xf32>
    %32 = vector.broadcast %29 : vector<1x128xf32> to vector<128x128xf32>
    %33 = arith.addf %31, %32 : vector<128x128xf32>
    %cst_29 = arith.constant 0.000000e+00 : f32
    %34 = vector.broadcast %cst_29 : f32 to vector<128x128xf32>
    %35 = arith.maximumf %33, %34 : vector<128x128xf32>
    %c0_30 = arith.constant 0 : index
    %c0_31 = arith.constant 0 : index
    %36 = vector.load %arg13[%c0_30, %c0_31] : memref<128x128xf32, #tpu.memory_space<vmem>>, vector<128x128xf32>
    tpu.vector_store %arg13[%c0_30, %c0_31], %35 {strides = array<i32>} : memref<128x128xf32, #tpu.memory_space<vmem>>, vector<128x128xf32>,
    return
  }
  func.func @transform_0(%arg0: i32) -> (i32, i32) {
    %c0_i32 = arith.constant 0 : i32
    %c0_i32_0 = arith.constant 0 : i32
    return %arg0, %c0_i32 : i32, i32
  }
  func.func @transform_1(%arg0: i32) -> (i32, i32) {
    %c0_i32 = arith.constant 0 : i32
    %c0_i32_0 = arith.constant 0 : i32
    return %arg0, %c0_i32 : i32, i32
  }
  func.func @transform_2(%arg0: i32) -> (i32, i32) {
    %c0_i32 = arith.constant 0 : i32
    %c0_i32_0 = arith.constant 0 : i32
    return %arg0, %c0_i32 : i32, i32
  }
  func.func @transform_3(%arg0: i32) -> (i32, i32) {
    %c0_i32 = arith.constant 0 : i32
    %c0_i32_0 = arith.constant 0 : i32
    return %arg0, %c0_i32 : i32, i32
  }
  func.func @transform_4(%arg0: i32) -> (i32, i32) {
    %c0_i32 = arith.constant 0 : i32
    %c0_i32_0 = arith.constant 0 : i32
    %c0_i32_1 = arith.constant 0 : i32
    return %c0_i32, %c0_i32_0 : i32, i32
  }
  func.func @transform_5(%arg0: i32) -> (i32, i32) {
    %c0_i32 = arith.constant 0 : i32
    %c0_i32_0 = arith.constant 0 : i32
    %c0_i32_1 = arith.constant 0 : i32
    return %c0_i32, %c0_i32_0 : i32, i32
  }
  func.func @transform_6(%arg0: i32) -> (i32, i32) {
    %c0_i32 = arith.constant 0 : i32
    %c0_i32_0 = arith.constant 0 : i32
    %c0_i32_1 = arith.constant 0 : i32
    return %c0_i32, %c0_i32_0 : i32, i32
  }
  func.func @transform_7(%arg0: i32) -> (i32, i32) {
    %c0_i32 = arith.constant 0 : i32
    %c0_i32_0 = arith.constant 0 : i32
    %c0_i32_1 = arith.constant 0 : i32
    return %c0_i32, %c0_i32_0 : i32, i32
  }
  func.func @transform_8(%arg0: i32) -> (i32, i32) {
    %c0_i32 = arith.constant 0 : i32
    %c0_i32_0 = arith.constant 0 : i32
    %c0_i32_1 = arith.constant 0 : i32
    return %c0_i32, %c0_i32_0 : i32, i32
  }
  func.func @transform_9(%arg0: i32) -> (i32, i32) {
    %c0_i32 = arith.constant 0 : i32
    %c0_i32_0 = arith.constant 0 : i32
    %c0_i32_1 = arith.constant 0 : i32
    return %c0_i32, %c0_i32_0 : i32, i32
  }
  func.func @transform_10(%arg0: i32) -> (i32, i32) {
    %c0_i32 = arith.constant 0 : i32
    %c0_i32_0 = arith.constant 0 : i32
    %c0_i32_1 = arith.constant 0 : i32
    return %c0_i32, %c0_i32_0 : i32, i32
  }
  func.func @transform_11(%arg0: i32) -> (i32, i32) {
    %c0_i32 = arith.constant 0 : i32
    %c0_i32_0 = arith.constant 0 : i32
    %c0_i32_1 = arith.constant 0 : i32
    return %c0_i32, %c0_i32_0 : i32, i32
  }
  func.func @transform_12(%arg0: i32) -> (i32, i32) {
    %c0_i32 = arith.constant 0 : i32
    %c0_i32_0 = arith.constant 0 : i32
    return %arg0, %c0_i32 : i32, i32
  }
}

</mosaic_0001>

<bundles_post_ra>
// kernel: mul.1
= control target key start
LH: loop header
LB: loop body
LE: loop exit
PB: predicated region body
PF: predicated region fallthrough
CT: control target
= control target key end

     0   :  { %s34_s0 = inlined_call_operand.vmem [shape: f32[1024], index: 0, kind: input, shape index: {}]   ;;  %s35_s1 = inlined_call_operand.vmem [shape: f32[1024], index: 1, kind: input, shape index: {}]   ;;  %s36_s2 = inlined_call_operand.vmem [shape: f32[1024], index: 2, kind: output, shape index: {}]  }
   0x1   :  { %v3_v0 = vld [vmem:[%s34_s0] sm:$0xff] }
   0x2   :  { %v4_v1 = vld [vmem:[%s35_s1] sm:$0xff] }
   0x3   :  { %v7_v2 = vmul.f32 %v4_v1, %v3_v0 }
   0x5   :  { %9 = vst [vmem:[%s36_s2] sm:$0xff] %v7_v2 }

// kernel: forward.9
= control target key start
LH: loop header
LB: loop body
LE: loop exit
PB: predicated region body
PF: predicated region fallthrough
CT: control target
= control target key end

     0   :  { %s782_s12 = smov 0   ;;  %s853_s0 = inlined_call_operand.vmem [shape: bf16[256,128], index: 0, kind: input, shape index: {}]   ;;  %s854_s1 = inlined_call_operand.vmem [shape: bf16[128,128], index: 1, kind: input, shape index: {}]   ;;  %s855_s2 = inlined_call_operand.vmem [shape: f32[1,128], index: 2, kind: input, shape index: {}]   ;;  %s856_s3 = inlined_call_operand.vmem [shape: bf16[256,128], index: 3, kind: output, shape index: {}]  }
   0x1 LB: > { %s559_s13 = sadd.s32 4294967295, %s760_s12   ;;  %p563_p0 = scmp.ge.s32.totalorder %s760_s12, 1  ;;  %s760_s12 = sphi %s782_s12, %s13_s12  }
   0x2   : > { %p138_p1 = scmp.lt.s32.totalorder %s760_s12, 3 }
   0x4   : > { %p139_p2 = pnand %p563_p0, %p138_p1 }
   0x5   : > { %v738_v0 = vld [vmem:[%s854_s1] sm:$0xff] (!%p139_p2)   ;;  %s564_s16 = sshll.u32 (!%p139_p2), %s559_s13, 4  ;;  %v739_v1 = vld [vmem:[%s854_s1 + $0x8] sm:$0xff] (!%p139_p2)   ;;  %v740_v2 = vld [vmem:[%s854_s1 + $0x10] sm:$0xff] (!%p139_p2)  }
   0x6   : > { %142 = sbr.rel (%p139_p2) target bundleno = 268 (0x10c), region = 32  ;;  %p163_p3 = scmp.lt.s32.totalorder (!%p139_p2), %s564_s16, 31  ;;  %682 = vmatprep.subr.bf16.mxu0 (!%p139_p2), %v738_v0  ;;  %714 = vmatprep.subr.bf16.mxu1 (!%p139_p2), %v738_v0  ;;  %v741_v3 = vld [vmem:[%s854_s1 + $0x18] sm:$0xff] (!%p139_p2)   ;;  %v742_v6 = vld [vmem:[%s854_s1 + $0x20] sm:$0xff] (!%p139_p2)   ;;  %v743_v7 = vld [vmem:[%s854_s1 + $0x28] sm:$0xff] (!%p139_p2)  }
   0x7   : > { %683 = vmatpush3.bf16.msra.mxu0 (!%p139_p2), %v738_v0  ;;  %722 = vmatpush3.bf16.msra.mxu1 (!%p139_p2), %v738_v0  ;;  %v744_v8 = vld [vmem:[%s854_s1 + $0x30] sm:$0xff] (!%p139_p2)   ;;  %v745_v9 = vld [vmem:[%s854_s1 + $0x38] sm:$0xff] (!%p139_p2)   ;;  %v568_v16 = vld [vmem:[%s855_s2] ss:$0 sm:$0xff] (!%p139_p2) }
   0x8   : > { %684 = vmatprep.subr.bf16.mxu0 (!%p139_p2), %v739_v1  ;;  %715 = vmatprep.subr.bf16.mxu1 (!%p139_p2), %v739_v1 }
   0xb   : > { %685 = vmatpush3.bf16.msra.mxu0 (!%p139_p2), %v739_v1  ;;  %723 = vmatpush3.bf16.msra.mxu1 (!%p139_p2), %v739_v1 }
   0xc   : > { %686 = vmatprep.subr.bf16.mxu0 (!%p139_p2), %v740_v2  ;;  %716 = vmatprep.subr.bf16.mxu1 (!%p139_p2), %v740_v2 }
   0xd   : > { %s858_s16 = smov (!%p163_p3, %s564_s16), 31 }
   0xe   : > { %s565_s21 = sshll.u32 %s858_s16, 2 }
   0xf   : > { %s807_s24 = scalar_lea.vmem %s853_s0, %s565_s21  ;;  %687 = vmatpush3.bf16.msra.mxu0 %v740_v2  ;;  %724 = vmatpush3.bf16.msra.mxu1 %v740_v2  ;;  %s840_s13 = scalar_lea.vmem %s856_s3, %s565_s21 }
  0x10   : > { %v746_v4 = vld [vmem:[%s807_s24] sm:$0xff]   ;;  %688 = vmatprep.subr.bf16.mxu0 %v741_v3  ;;  %717 = vmatprep.subr.bf16.mxu1 %v741_v3  ;;  %v748_v10 = vld [vmem:[%s807_s24 + $0x8] sm:$0xff]   ;;  %v750_v12 = vld [vmem:[%s807_s24 + $0x10] sm:$0xff]  }
  0x11   : > { %v747_v5 = vld [vmem:[%s807_s24 + $0x20] sm:$0xff]   ;;  %698 = vmatprep.mubr.bf16.mxu0 %v746_v4  ;;  %v749_v11 = vld [vmem:[%s807_s24 + $0x28] sm:$0xff]   ;;  %v751_v13 = vld [vmem:[%s807_s24 + $0x30] sm:$0xff]  }
  0x12   : > { %706 = vmatprep.mubr.bf16.mxu1 %v747_v5  ;;  %v752_v14 = vld [vmem:[%s807_s24 + $0x18] sm:$0xff]  }
  0x13   : > { %689 = vmatpush3.bf16.msra.mxu0 %v741_v3  ;;  %725 = vmatpush3.bf16.msra.mxu1 %v741_v3  ;;  %v753_v15 = vld [vmem:[%s807_s24 + $0x38] sm:$0xff]  }
  0x14   : > { %690 = vmatprep.subr.bf16.mxu0 %v742_v6  ;;  %718 = vmatprep.subr.bf16.mxu1 %v742_v6 }
  0x17   : > { %691 = vmatpush3.bf16.msra.mxu0 %v742_v6  ;;  %726 = vmatpush3.bf16.msra.mxu1 %v742_v6 }
  0x18   : > { %692 = vmatprep.subr.bf16.mxu0 %v743_v7  ;;  %719 = vmatprep.subr.bf16.mxu1 %v743_v7 }
  0x1b   : > { %693 = vmatpush3.bf16.msra.mxu0 %v743_v7  ;;  %727 = vmatpush3.bf16.msra.mxu1 %v743_v7 }
  0x1c   : > { %694 = vmatprep.subr.bf16.mxu0 %v744_v8  ;;  %720 = vmatprep.subr.bf16.mxu1 %v744_v8 }
  0x1f   : > { %695 = vmatpush3.bf16.msra.mxu0 %v744_v8  ;;  %728 = vmatpush3.bf16.msra.mxu1 %v744_v8 }
  0x20   : > { %696 = vmatprep.subr.bf16.mxu0 %v745_v9  ;;  %721 = vmatprep.subr.bf16.mxu1 %v745_v9 }
  0x23   : > { %697 = vmatpush3.bf16.msra.mxu0 %v745_v9  ;;  %729 = vmatpush3.bf16.msra.mxu1 %v745_v9 }
  0x26   : > { %699 = vmatmul.mubr.bf16.vlgmr.msra.gmra.mrb[0].mxu0 %v748_v10  ;;  %707 = vmatmul.mubr.bf16.vlgmr.msra.gmra.mrb[0].mxu1 %v749_v11 }
  0x27   : > { %702 = vmatprep.mubr.bf16.mxu0 %v750_v12  ;;  %710 = vmatprep.mubr.bf16.mxu1 %v751_v13 }
  0x2e   : > { %703 = vmatmul.mubr.bf16.gmra.mrb[4].mxu0 %v752_v14  ;;  %711 = vmatmul.mubr.bf16.gmra.mrb[4].mxu1 %v753_v15 }
  0xf9   : > { %v700_v17 = vpop.f32.mrb[0].mxu0  ;;  %v708_v18 = vpop.f32.mrb[0].mxu1 }
  0xfa   : > { %v353_v19 = vadd.f32 %v700_v17, %v568_v16  ;;  %v385_v20 = vadd.f32 %v708_v18, %v568_v16  ;;  %v344_v21 = vpop.f32.mrb[1].mxu0  ;;  %v376_v22 = vpop.f32.mrb[1].mxu1 }
  0xfb   : > { %v345_v23 = vadd.f32 %v568_v16, %v344_v21  ;;  %v377_v24 = vadd.f32 %v568_v16, %v376_v22  ;;  %v701_v25 = vpop.f32.mrb[2].mxu0  ;;  %v709_v26 = vpop.f32.mrb[2].mxu1 }
  0xfc   : > { %v356_v27 = vadd.f32 %v701_v25, %v568_v16  ;;  %v388_v28 = vadd.f32 %v709_v26, %v568_v16  ;;  %v347_v29 = vpop.f32.mrb[3].mxu0  ;;  %v379_v30 = vpop.f32.mrb[3].mxu1  ;;  %v409_v33 = vmax.f32 %v353_v19, 0.0  ;;  %v417_v34 = vmax.f32 %v385_v20, 0.0 }
  0xfd   : > { %v348_v31 = vadd.f32 %v568_v16, %v347_v29  ;;  %v380_v32 = vadd.f32 %v568_v16, %v379_v30  ;;  %v407_v37 = vmax.f32 %v345_v23, 0.0  ;;  %v415_v38 = vmax.f32 %v377_v24, 0.0 }
  0xfe   : > { %v410_v35 = vmax.f32 %v356_v27, 0.0  ;;  %v418_v36 = vmax.f32 %v388_v28, 0.0 }
  0xff   : > { %v408_v39 = vmax.f32 %v348_v31, 0.0  ;;  %v416_v40 = vmax.f32 %v380_v32, 0.0 }
 0x100   : > { %v627_v41 = vpack.c.bf16 %v410_v35, %v409_v33  ;;  %v647_v42 = vpack.c.bf16 %v418_v36, %v417_v34 }
 0x101   : > { %v622_v43 = vpack.c.bf16 %v408_v39, %v407_v37  ;;  %v642_v44 = vpack.c.bf16 %v416_v40, %v415_v38  ;;  %v704_v45 = vpop.f32.mrb[4].mxu0  ;;  %v712_v46 = vpop.f32.mrb[4].mxu1 }
 0x102   : > { %659 = vst [vmem:[%s840_s13 + $0x8] sm:$0xff] %v627_v41   ;;  %663 = vst [vmem:[%s840_s13 + $0x28] sm:$0xff] %v647_v42   ;;  %v369_v47 = vadd.f32 %v704_v45, %v568_v16  ;;  %v401_v48 = vadd.f32 %v712_v46, %v568_v16  ;;  %v360_v49 = vpop.f32.mrb[5].mxu0  ;;  %v392_v50 = vpop.f32.mrb[5].mxu1 }
 0x103   : > { %623 = vst [vmem:[%s840_s13] sm:$0xff] %v622_v43   ;;  %662 = vst [vmem:[%s840_s13 + $0x20] sm:$0xff] %v642_v44   ;;  %v361_v51 = vadd.f32 %v568_v16, %v360_v49  ;;  %v393_v52 = vadd.f32 %v568_v16, %v392_v50  ;;  %v705_v53 = vpop.f32.mrb[6].mxu0  ;;  %v713_v54 = vpop.f32.mrb[6].mxu1 }
 0x104   : > { %v372_v55 = vadd.f32 %v705_v53, %v568_v16  ;;  %v404_v56 = vadd.f32 %v713_v54, %v568_v16  ;;  %v363_v57 = vpop.f32.mrb[7].mxu0  ;;  %v395_v58 = vpop.f32.mrb[7].mxu1  ;;  %v413_v61 = vmax.f32 %v369_v47, 0.0  ;;  %v421_v62 = vmax.f32 %v401_v48, 0.0 }
 0x105   : > { %v364_v59 = vadd.f32 %v568_v16, %v363_v57  ;;  %v396_v60 = vadd.f32 %v568_v16, %v395_v58  ;;  %v411_v1 = vmax.f32 %v361_v51, 0.0  ;;  %v419_v2 = vmax.f32 %v393_v52, 0.0 }
 0x106   : > { %v414_v63 = vmax.f32 %v372_v55, 0.0  ;;  %v422_v0 = vmax.f32 %v404_v56, 0.0 }
 0x107   : > { %v412_v3 = vmax.f32 %v364_v59, 0.0  ;;  %v420_v4 = vmax.f32 %v396_v60, 0.0 }
 0x108   : > { %v637_v5 = vpack.c.bf16 %v414_v63, %v413_v61  ;;  %v657_v6 = vpack.c.bf16 %v422_v0, %v421_v62 }
 0x109   : > { %v632_v7 = vpack.c.bf16 %v412_v3, %v411_v1  ;;  %v652_v8 = vpack.c.bf16 %v420_v4, %v419_v2 }
 0x10a   : > { %661 = vst [vmem:[%s840_s13 + $0x18] sm:$0xff] %v637_v5   ;;  %665 = vst [vmem:[%s840_s13 + $0x38] sm:$0xff] %v657_v6  }
 0x10b   : > { %660 = vst [vmem:[%s840_s13 + $0x10] sm:$0xff] %v632_v7   ;;  %664 = vst [vmem:[%s840_s13 + $0x30] sm:$0xff] %v652_v8  }
 0x10c PF: > { %s13_s12 = sadd.s32 1, %s760_s12  }
 0x10d   : > { %p10_p4 = scmp.ge.s32.totalorder %s13_s12, 4  }
 0x10f   :  { %12 = sbr.rel (!%p10_p4) target bundleno = 1 (0x1), region = 62 }

// kernel: forward.10
= control target key start
LH: loop header
LB: loop body
LE: loop exit
PB: predicated region body
PF: predicated region fallthrough
CT: control target
= control target key end

     0   :  { %s1091_s9 = smov 0   ;;  %s1093_s10 = smov 0   ;;  %s1233_s0 = inlined_call_operand.vmem [shape: bf16[256,256], index: 0, kind: input, shape index: {}]   ;;  %s1234_s1 = inlined_call_operand.vmem [shape: bf16[256,128], index: 1, kind: input, shape index: {}]   ;;  %s1235_s2 = inlined_call_operand.vmem [shape: bf16[256,128], index: 2, kind: output, shape index: {}]  }
   0x1   :  { %s1095_s11 = smov 0   ;;  %s1097_s12 = smov 0  }
   0x2   :  { %s1099_s13 = smov 0   ;;  %s1101_s14 = smov 0  }
   0x3   :  { %s1103_s15 = smov 0  }
   0x4 LB: > { %s21_s16 = sadd.s32 1, %s1065_s13  ;;  %s24_s17 = sadd.s32 1, %s1069_s14  ;;  %s1073_s15 = sphi %s1103_s15, %s12_s15   ;;  %s1069_s14 = sphi %s1101_s14, %s1241_s14   ;;  %s1065_s13 = sphi %s1099_s13, %s1240_s13   ;;  %s1061_s12 = sphi %s1097_s12, %s1239_s12   ;;  %s1057_s11 = sphi %s1095_s11, %s1238_s11   ;;  %s1053_s10 = sphi %s1093_s10, %s1237_s10   ;;  %s1049_s9 = sphi %s1091_s9, %s1236_s9  }
   0x5   : > { %p22_p0 = scmp.ge.s32.totalorder %s21_s16, 2  ;;  %p40_p1 = scmp.ne.s32.totalorder %s1053_s10, %s1049_s9 }
   0x6   : > { %p41_p2 = scmp.eq.s32.totalorder %s1073_s15, 0  ;;  %s33_s21 = sadd.s32 1, %s1053_s10 }
   0x7   : > { %s1243_s16 = smov (%p22_p0, %s21_s16), 0  ;;  %s1245_s17 = smov (!%p22_p0, %s24_s17), %s1069_s14 }
   0x8   : > { %p42_p3 = por %p41_p2, %p40_p1  ;;  %p26_p4 = scmp.ge.s32.totalorder %s1245_s17, 2 }
   0x9   : > { %s29_s18 = ssub.s32 %s1065_s13, %s1243_s16  ;;  %p771_p6 = scmp.ge.s32.totalorder %s1073_s15, 4 }
   0xa   : > { %s1247_s17 = smov (%p26_p4, %s1245_s17), 0 }
   0xb   : > { %s28_s19 = ssub.s32 %s1069_s14, %s1247_s17  ;;  %118 = sbr.rel (%p771_p6) target bundleno = 34 (0x22), region = 16 }
   0xc   : > { %s30_s20 = sor.u32 %s29_s18, %s28_s19 }
   0xd   : > { %p31_p5 = scmp.eq.s32.totalorder %s30_s20, 0 }
   0xf   : > { %s1142_s22 = scalar_select %p31_p5, %s1053_s10, %s33_s21  }
  0x12   : > { %121 = sbr.rel (!%p42_p3) target bundleno = 34 (0x22), region = 20  ;;  %s123_s23 = sand.u32 (%p42_p3), 1, %s1053_s10  }
  0x13   : > { %s818_s24 = sshll.u32 (%p42_p3), %s1069_s14, 5  ;;  %s772_s25 = sshll.u32 (%p42_p3), %s123_s23, 6 }
  0x14   : > { %s128_s26 = sadd.s32 (%p42_p3), %s1065_s13, %s818_s24  ;;  %s125_s3 = scalar_lea.vmem (%p42_p3), [#allocation3], %s772_s25 }
  0x15   : > { %s775_s27 = sshll.u32 (%p42_p3), %s128_s26, 2 }
  0x16   : > { %s1151_s30 = scalar_lea.vmem (%p42_p3), %s1233_s0, %s775_s27 }
  0x17   : > { %v146_v0 = vld [vmem:[%s1151_s30] sm:$0xf] (%p42_p3)  ;;  %v148_v1 = vld [vmem:[%s1151_s30 + $0x8] sm:$0xf] (%p42_p3)  ;;  %v150_v2 = vld [vmem:[%s1151_s30 + $0x10] sm:$0xf] (%p42_p3) }
  0x18   : > { %147 = vst [vmem:[%s125_s3] sm:$0xf] (%p42_p3), %v146_v0  ;;  %149 = vst [vmem:[%s125_s3 + $0x4] sm:$0xf] (%p42_p3), %v148_v1  ;;  %v152_v3 = vld [vmem:[%s1151_s30 + $0x18] sm:$0xf] (%p42_p3) }
  0x19   : > { %151 = vst [vmem:[%s125_s3 + $0x8] sm:$0xf] %v150_v2  ;;  %v154_v4 = vld [vmem:[%s1151_s30 + $0x20] sm:$0xf]  ;;  %v156_v5 = vld [vmem:[%s1151_s30 + $0x28] sm:$0xf] }
  0x1a   : > { %153 = vst [vmem:[%s125_s3 + $0xc] sm:$0xf] %v152_v3  ;;  %155 = vst [vmem:[%s125_s3 + $0x10] sm:$0xf] %v154_v4  ;;  %v158_v6 = vld [vmem:[%s1151_s30 + $0x30] sm:$0xf] }
  0x1b   : > { %157 = vst [vmem:[%s125_s3 + $0x14] sm:$0xf] %v156_v5  ;;  %v160_v7 = vld [vmem:[%s1151_s30 + $0x38] sm:$0xf]  ;;  %v162_v8 = vld [vmem:[%s1151_s30 + $0x40] sm:$0xf] }
  0x1c   : > { %159 = vst [vmem:[%s125_s3 + $0x18] sm:$0xf] %v158_v6  ;;  %161 = vst [vmem:[%s125_s3 + $0x1c] sm:$0xf] %v160_v7  ;;  %v164_v9 = vld [vmem:[%s1151_s30 + $0x48] sm:$0xf] }
  0x1d   : > { %163 = vst [vmem:[%s125_s3 + $0x20] sm:$0xf] %v162_v8  ;;  %v166_v10 = vld [vmem:[%s1151_s30 + $0x50] sm:$0xf]  ;;  %v168_v11 = vld [vmem:[%s1151_s30 + $0x58] sm:$0xf] }
  0x1e   : > { %165 = vst [vmem:[%s125_s3 + $0x24] sm:$0xf] %v164_v9  ;;  %167 = vst [vmem:[%s125_s3 + $0x28] sm:$0xf] %v166_v10  ;;  %v170_v12 = vld [vmem:[%s1151_s30 + $0x60] sm:$0xf] }
  0x1f   : > { %169 = vst [vmem:[%s125_s3 + $0x2c] sm:$0xf] %v168_v11  ;;  %v172_v13 = vld [vmem:[%s1151_s30 + $0x68] sm:$0xf]  ;;  %v174_v14 = vld [vmem:[%s1151_s30 + $0x70] sm:$0xf] }
  0x20   : > { %171 = vst [vmem:[%s125_s3 + $0x30] sm:$0xf] %v170_v12  ;;  %173 = vst [vmem:[%s125_s3 + $0x34] sm:$0xf] %v172_v13  ;;  %v176_v15 = vld [vmem:[%s1151_s30 + $0x78] sm:$0xf] }
  0x21   : > { %175 = vst [vmem:[%s125_s3 + $0x38] sm:$0xf] %v174_v14  ;;  %177 = vst [vmem:[%s125_s3 + $0x3c] sm:$0xf] %v176_v15 }
  0x22 PF: > { %p776_p7 = scmp.ge.s32.totalorder %s1073_s15, 1  ;;  %p240_p8 = scmp.lt.s32.totalorder %s1073_s15, 5 }
  0x24   : > { %p241_p9 = pnand %p776_p7, %p240_p8 }
  0x25   : > { %s247_s4 = sand.u32 (!%p241_p9), 1, %s1049_s9   ;;  %s778_s5 = sshll.u32 (!%p241_p9), %s1057_s11, 4 }
  0x26   : > { %244 = sbr.rel (%p241_p9) target bundleno = 325 (0x145), region = 65  ;;  %s777_s6 = sshll.u32 (!%p241_p9), %s247_s4, 6 }
  0x27   : > { %p275_p10 = scmp.lt.s32.totalorder (!%p241_p9), %s778_s5, 31  ;;  %s780_s7 = sshll.u32 (!%p241_p9), %s1061_s12, 4 }
  0x28   : > { %p281_p11 = scmp.lt.s32.totalorder (!%p241_p9), %s780_s7, 31  ;;  %s1184_s9 = scalar_lea.vmem (!%p241_p9), [#allocation3], %s777_s6 }
  0x29   : > { %p782_p12 = scmp.ne.s32.totalorder (!%p241_p9), %s1057_s11, 0 }
  0x2d   : > { %s1249_s5 = smov (!%p275_p10, %s778_s5), 31  ;;  %s1251_s7 = smov (!%p281_p11, %s780_s7), 31 }
  0x2e   : > { %s779_s8 = sshll.u32 %s1249_s5, 2  ;;  %s781_s21 = sshll.u32 %s1251_s7, 2  ;;  %v1075_v16 = vmov (!%p782_p12), 0.0  }
  0x2f   : > { %s1177_s20 = scalar_lea.vmem %s1234_s1, %s779_s8  ;;  %s1182_s25 = scalar_lea.vmem %s1235_s2, %s781_s21  ;;  %291 = vst [vmem:[#allocation2] sm:$0xff] (!%p782_p12), %v1075_v16  ;;  %292 = vst [vmem:[#allocation2 + $0x8] sm:$0xff] (!%p782_p12), %v1075_v16 }
  0x30   : > { %290 = sbr.rel (%p782_p12) target bundleno = 55 (0x37), region = 73  ;;  %293 = vst [vmem:[#allocation2 + $0x10] sm:$0xff] (!%p782_p12), %v1075_v16  ;;  %294 = vst [vmem:[#allocation2 + $0x18] sm:$0xff] (!%p782_p12), %v1075_v16 }
  0x31   : > { %295 = vst [vmem:[#allocation2 + $0x20] sm:$0xff] (!%p782_p12), %v1075_v16  ;;  %296 = vst [vmem:[#allocation2 + $0x28] sm:$0xff] (!%p782_p12), %v1075_v16 }
  0x32   : > { %297 = vst [vmem:[#allocation2 + $0x30] sm:$0xff] (!%p782_p12), %v1075_v16  ;;  %298 = vst [vmem:[#allocation2 + $0x38] sm:$0xff] (!%p782_p12), %v1075_v16 }
  0x33   : > { %299 = vst [vmem:[#allocation2 + $0x40] sm:$0xff] (!%p782_p12), %v1075_v16  ;;  %300 = vst [vmem:[#allocation2 + $0x48] sm:$0xff] (!%p782_p12), %v1075_v16 }
  0x34   : > { %301 = vst [vmem:[#allocation2 + $0x50] sm:$0xff] (!%p782_p12), %v1075_v16  ;;  %302 = vst [vmem:[#allocation2 + $0x58] sm:$0xff] (!%p782_p12), %v1075_v16 }
  0x35   : > { %303 = vst [vmem:[#allocation2 + $0x60] sm:$0xff] (!%p782_p12), %v1075_v16  ;;  %304 = vst [vmem:[#allocation2 + $0x68] sm:$0xff] (!%p782_p12), %v1075_v16 }
  0x36   : > { %305 = vst [vmem:[#allocation2 + $0x70] sm:$0xff] (!%p782_p12), %v1075_v16  ;;  %306 = vst [vmem:[#allocation2 + $0x78] sm:$0xff] (!%p782_p12), %v1075_v16 }
  0x37 PF: > { %v1003_v17 = vld [vmem:[%s1177_s20] sm:$0xff]   ;;  %v1004_v18 = vld [vmem:[%s1177_s20 + $0x8] sm:$0xff]   ;;  %v1005_v19 = vld [vmem:[%s1177_s20 + $0x10] sm:$0xff]   ;;  %p799_p13 = scmp.ne.s32.totalorder %s1057_s11, 1 }
  0x38   : > { %898 = vmatprep.subr.bf16.mxu0 %v1003_v17  ;;  %930 = vmatprep.subr.bf16.mxu1 %v1003_v17  ;;  %v1006_v20 = vld [vmem:[%s1177_s20 + $0x18] sm:$0xff]   ;;  %v1011_v21 = vld [vmem:[%s1184_s9] sm:$0xff]   ;;  %v1008_v24 = vld [vmem:[%s1177_s20 + $0x28] sm:$0xff]  }
  0x39   : > { %899 = vmatpush3.bf16.msra.mxu0 %v1003_v17  ;;  %938 = vmatpush3.bf16.msra.mxu1 %v1003_v17  ;;  %v1012_v22 = vld [vmem:[%s1184_s9 + $0x20] sm:$0xff]   ;;  %v1009_v25 = vld [vmem:[%s1177_s20 + $0x30] sm:$0xff]   ;;  %v1010_v26 = vld [vmem:[%s1177_s20 + $0x38] sm:$0xff]  }
  0x3a   : > { %900 = vmatprep.subr.bf16.mxu0 %v1004_v18  ;;  %931 = vmatprep.subr.bf16.mxu1 %v1004_v18  ;;  %v1007_v23 = vld [vmem:[%s1177_s20 + $0x20] sm:$0xff]   ;;  %v1013_v27 = vld [vmem:[%s1184_s9 + $0x8] sm:$0xff]   ;;  %v1015_v29 = vld [vmem:[%s1184_s9 + $0x10] sm:$0xff]  }
  0x3b   : > { %914 = vmatprep.mubr.bf16.mxu0 %v1011_v21  ;;  %922 = vmatprep.mubr.bf16.mxu1 %v1012_v22  ;;  %v1014_v28 = vld [vmem:[%s1184_s9 + $0x28] sm:$0xff]   ;;  %v1016_v30 = vld [vmem:[%s1184_s9 + $0x30] sm:$0xff]   ;;  %v1017_v31 = vld [vmem:[%s1184_s9 + $0x18] sm:$0xff]  }
  0x3c   : > { %v1018_v32 = vld [vmem:[%s1184_s9 + $0x38] sm:$0xff]   ;;  %v309_v33 = vld [vmem:[#allocation2 + $0x10] sm:$0xff]  ;;  %v307_v35 = vld [vmem:[#allocation2] sm:$0xff] }
  0x3d   : > { %901 = vmatpush3.bf16.msra.mxu0 %v1004_v18  ;;  %939 = vmatpush3.bf16.msra.mxu1 %v1004_v18  ;;  %v317_v34 = vld [vmem:[#allocation2 + $0x50] sm:$0xff]  ;;  %v315_v36 = vld [vmem:[#allocation2 + $0x40] sm:$0xff]  ;;  %v310_v39 = vld [vmem:[#allocation2 + $0x18] sm:$0xff] }
  0x3e   : > { %902 = vmatprep.subr.bf16.mxu0 %v1005_v19  ;;  %932 = vmatprep.subr.bf16.mxu1 %v1005_v19  ;;  %v318_v40 = vld [vmem:[#allocation2 + $0x58] sm:$0xff]  ;;  %v308_v45 = vld [vmem:[#allocation2 + $0x8] sm:$0xff]  ;;  %v313_v57 = vld [vmem:[#allocation2 + $0x30] sm:$0xff] }
  0x3f   : > { %v316_v46 = vld [vmem:[#allocation2 + $0x48] sm:$0xff]  ;;  %v321_v58 = vld [vmem:[#allocation2 + $0x70] sm:$0xff]  ;;  %v311_v59 = vld [vmem:[#allocation2 + $0x20] sm:$0xff] }
  0x40   : > { %v319_v60 = vld [vmem:[#allocation2 + $0x60] sm:$0xff]  ;;  %v314_v63 = vld [vmem:[#allocation2 + $0x38] sm:$0xff]  ;;  %v312_v5 = vld [vmem:[#allocation2 + $0x28] sm:$0xff] }
  0x41   : > { %903 = vmatpush3.bf16.msra.mxu0 %v1005_v19  ;;  %940 = vmatpush3.bf16.msra.mxu1 %v1005_v19  ;;  %v322_v0 = vld [vmem:[#allocation2 + $0x78] sm:$0xff]  ;;  %v320_v6 = vld [vmem:[#allocation2 + $0x68] sm:$0xff] }
  0x42   : > { %904 = vmatprep.subr.bf16.mxu0 %v1006_v20  ;;  %933 = vmatprep.subr.bf16.mxu1 %v1006_v20 }
  0x45   : > { %905 = vmatpush3.bf16.msra.mxu0 %v1006_v20  ;;  %941 = vmatpush3.bf16.msra.mxu1 %v1006_v20 }
  0x46   : > { %906 = vmatprep.subr.bf16.mxu0 %v1007_v23  ;;  %934 = vmatprep.subr.bf16.mxu1 %v1007_v23 }
  0x49   : > { %907 = vmatpush3.bf16.msra.mxu0 %v1007_v23  ;;  %942 = vmatpush3.bf16.msra.mxu1 %v1007_v23 }
  0x4a   : > { %908 = vmatprep.subr.bf16.mxu0 %v1008_v24  ;;  %935 = vmatprep.subr.bf16.mxu1 %v1008_v24 }
  0x4d   : > { %909 = vmatpush3.bf16.msra.mxu0 %v1008_v24  ;;  %943 = vmatpush3.bf16.msra.mxu1 %v1008_v24 }
  0x4e   : > { %910 = vmatprep.subr.bf16.mxu0 %v1009_v25  ;;  %936 = vmatprep.subr.bf16.mxu1 %v1009_v25 }
  0x51   : > { %911 = vmatpush3.bf16.msra.mxu0 %v1009_v25  ;;  %944 = vmatpush3.bf16.msra.mxu1 %v1009_v25 }
  0x52   : > { %912 = vmatprep.subr.bf16.mxu0 %v1010_v26  ;;  %937 = vmatprep.subr.bf16.mxu1 %v1010_v26 }
  0x55   : > { %913 = vmatpush3.bf16.msra.mxu0 %v1010_v26  ;;  %945 = vmatpush3.bf16.msra.mxu1 %v1010_v26 }
  0x58   : > { %915 = vmatmul.mubr.bf16.vlgmr.msra.gmra.mrb[0].mxu0 %v1013_v27  ;;  %923 = vmatmul.mubr.bf16.vlgmr.msra.gmra.mrb[0].mxu1 %v1014_v28 }
  0x59   : > { %918 = vmatprep.mubr.bf16.mxu0 %v1015_v29  ;;  %926 = vmatprep.mubr.bf16.mxu1 %v1016_v30 }
  0x60   : > { %919 = vmatmul.mubr.bf16.gmra.mrb[4].mxu0 %v1017_v31  ;;  %927 = vmatmul.mubr.bf16.gmra.mrb[4].mxu1 %v1018_v32 }
 0x12b   : > { %v916_v37 = vpop.f32.mrb[0].mxu0  ;;  %v924_v38 = vpop.f32.mrb[0].mxu1 }
 0x12c   : > { %v550_v41 = vadd.f32 %v916_v37, %v309_v33  ;;  %v558_v42 = vadd.f32 %v924_v38, %v317_v34  ;;  %v485_v43 = vpop.f32.mrb[1].mxu0  ;;  %v517_v44 = vpop.f32.mrb[1].mxu1 }
 0x12d   : > { %v548_v47 = vadd.f32 %v485_v43, %v307_v35  ;;  %v556_v48 = vadd.f32 %v517_v44, %v315_v36  ;;  %v917_v49 = vpop.f32.mrb[2].mxu0  ;;  %v925_v50 = vpop.f32.mrb[2].mxu1 }
 0x12e   : > { %566 = vst [vmem:[#allocation2 + $0x10] sm:$0xff] %v550_v41  ;;  %574 = vst [vmem:[#allocation2 + $0x50] sm:$0xff] %v558_v42  ;;  %v551_v51 = vadd.f32 %v917_v49, %v310_v39  ;;  %v559_v52 = vadd.f32 %v925_v50, %v318_v40  ;;  %v488_v53 = vpop.f32.mrb[3].mxu0  ;;  %v520_v54 = vpop.f32.mrb[3].mxu1 }
 0x12f   : > { %564 = vst [vmem:[#allocation2] sm:$0xff] %v548_v47  ;;  %572 = vst [vmem:[#allocation2 + $0x40] sm:$0xff] %v556_v48  ;;  %v549_v55 = vadd.f32 %v488_v53, %v308_v45  ;;  %v557_v56 = vadd.f32 %v520_v54, %v316_v46 }
 0x130   : > { %567 = vst [vmem:[#allocation2 + $0x18] sm:$0xff] %v551_v51  ;;  %575 = vst [vmem:[#allocation2 + $0x58] sm:$0xff] %v559_v52 }
 0x131   : > { %565 = vst [vmem:[#allocation2 + $0x8] sm:$0xff] %v549_v55  ;;  %573 = vst [vmem:[#allocation2 + $0x48] sm:$0xff] %v557_v56 }
 0x133   : > { %v920_v61 = vpop.f32.mrb[4].mxu0  ;;  %v928_v62 = vpop.f32.mrb[4].mxu1  ;;  %583 = sbr.rel (%p799_p13) target bundleno = 325 (0x145), region = 77 }
 0x134   : > { %v554_v1 = vadd.f32 %v920_v61, %v313_v57  ;;  %v562_v2 = vadd.f32 %v928_v62, %v321_v58  ;;  %v501_v3 = vpop.f32.mrb[5].mxu0  ;;  %v533_v4 = vpop.f32.mrb[5].mxu1 }
 0x135   : > { %v552_v7 = vadd.f32 %v501_v3, %v311_v59  ;;  %v560_v8 = vadd.f32 %v533_v4, %v319_v60  ;;  %v921_v9 = vpop.f32.mrb[6].mxu0  ;;  %v929_v10 = vpop.f32.mrb[6].mxu1  ;;  %v586_v19 = vld [vmem:[#allocation2 + $0x10] sm:$0xff] (!%p799_p13) }
 0x136   : > { %570 = vst [vmem:[#allocation2 + $0x30] sm:$0xff] %v554_v1  ;;  %578 = vst [vmem:[#allocation2 + $0x70] sm:$0xff] %v562_v2  ;;  %v555_v11 = vadd.f32 %v921_v9, %v314_v63  ;;  %v563_v12 = vadd.f32 %v929_v10, %v322_v0  ;;  %v504_v13 = vpop.f32.mrb[7].mxu0  ;;  %v536_v14 = vpop.f32.mrb[7].mxu1  ;;  %v584_v17 = vld [vmem:[#allocation2] sm:$0xff] (!%p799_p13)  ;;  %v594_v31 = vld [vmem:[#allocation2 + $0x50] sm:$0xff] (!%p799_p13) }
 0x137   : > { %568 = vst [vmem:[#allocation2 + $0x20] sm:$0xff] %v552_v7  ;;  %576 = vst [vmem:[#allocation2 + $0x60] sm:$0xff] %v560_v8  ;;  %v553_v15 = vadd.f32 %v504_v13, %v312_v5  ;;  %v561_v16 = vadd.f32 %v536_v14, %v320_v6  ;;  %v587_v21 = vld [vmem:[#allocation2 + $0x18] sm:$0xff] (!%p799_p13)  ;;  %v592_v28 = vld [vmem:[#allocation2 + $0x40] sm:$0xff] (!%p799_p13) }
 0x138   : > { %571 = vst [vmem:[#allocation2 + $0x38] sm:$0xff] %v555_v11  ;;  %579 = vst [vmem:[#allocation2 + $0x78] sm:$0xff] %v563_v12  ;;  %v585_v18 = vld [vmem:[#allocation2 + $0x8] sm:$0xff] (!%p799_p13)  ;;  %v843_v24 = vpack.c.bf16 (!%p799_p13), %v587_v21, %v586_v19  ;;  %v595_v32 = vld [vmem:[#allocation2 + $0x58] sm:$0xff] (!%p799_p13) }
 0x139   : > { %569 = vst [vmem:[#allocation2 + $0x28] sm:$0xff] %v553_v15  ;;  %577 = vst [vmem:[#allocation2 + $0x68] sm:$0xff] %v561_v16  ;;  %v838_v20 = vpack.c.bf16 (!%p799_p13), %v585_v18, %v584_v17  ;;  %v593_v30 = vld [vmem:[#allocation2 + $0x48] sm:$0xff] (!%p799_p13)  ;;  %v863_v34 = vpack.c.bf16 (!%p799_p13), %v595_v32, %v594_v31 }
 0x13a   : > { %875 = vst [vmem:[%s1182_s25 + $0x8] sm:$0xff] %v843_v24   ;;  %v858_v33 = vpack.c.bf16 %v593_v30, %v592_v28 }
 0x13b   : > { %839 = vst [vmem:[%s1182_s25] sm:$0xff] %v838_v20   ;;  %879 = vst [vmem:[%s1182_s25 + $0x28] sm:$0xff] %v863_v34  }
 0x13c   : > { %878 = vst [vmem:[%s1182_s25 + $0x20] sm:$0xff] %v858_v33  }
 0x13d   : > { %v590_v26 = vld [vmem:[#allocation2 + $0x30] sm:$0xff] }
 0x13e   : > { %v588_v22 = vld [vmem:[#allocation2 + $0x20] sm:$0xff]  ;;  %v598_v37 = vld [vmem:[#allocation2 + $0x70] sm:$0xff] }
 0x13f   : > { %v591_v27 = vld [vmem:[#allocation2 + $0x38] sm:$0xff]  ;;  %v596_v35 = vld [vmem:[#allocation2 + $0x60] sm:$0xff] }
 0x140   : > { %v589_v23 = vld [vmem:[#allocation2 + $0x28] sm:$0xff]  ;;  %v853_v29 = vpack.c.bf16 %v591_v27, %v590_v26  ;;  %v599_v39 = vld [vmem:[#allocation2 + $0x78] sm:$0xff] }
 0x141   : > { %v848_v25 = vpack.c.bf16 %v589_v23, %v588_v22  ;;  %v597_v36 = vld [vmem:[#allocation2 + $0x68] sm:$0xff]  ;;  %v873_v40 = vpack.c.bf16 %v599_v39, %v598_v37 }
 0x142   : > { %877 = vst [vmem:[%s1182_s25 + $0x18] sm:$0xff] %v853_v29   ;;  %v868_v38 = vpack.c.bf16 %v597_v36, %v596_v35 }
 0x143   : > { %876 = vst [vmem:[%s1182_s25 + $0x10] sm:$0xff] %v848_v25   ;;  %881 = vst [vmem:[%s1182_s25 + $0x38] sm:$0xff] %v873_v40  }
 0x144   : > { %880 = vst [vmem:[%s1182_s25 + $0x30] sm:$0xff] %v868_v38  }
 0x145 PF: > { %s12_s15 = sadd.s32 1, %s1073_s15   ;;  %s1236_s9 = smov %s1053_s10 }
 0x146   : > { %p9_p0 = scmp.ge.s32.totalorder %s12_s15, 6   ;;  %s1237_s10 = smov %s1142_s22 }
 0x147   : > { %s1238_s11 = smov %s1065_s13  ;;  %s1239_s12 = smov %s1069_s14 }
 0x148   : > { %s1240_s13 = smov %s1243_s16  ;;  %s1241_s14 = smov %s1247_s17 }
 0x149   :  { %11 = sbr.rel (!%p9_p0) target bundleno = 4 (0x4), region = 115 }

// kernel: forward.13
= control target key start
LH: loop header
LB: loop body
LE: loop exit
PB: predicated region body
PF: predicated region fallthrough
CT: control target
= control target key end

     0   :  { %s1627_s21 = smov 0   ;;  %s1829_s0 = inlined_call_operand.vmem [shape: bf16[256,128], index: 0, kind: input, shape index: {}]   ;;  %s1830_s1 = inlined_call_operand.vmem [shape: bf16[256,128], index: 1, kind: input, shape index: {}]   ;;  %s1831_s2 = inlined_call_operand.vmem [shape: bf16[256,128], index: 2, kind: input, shape index: {}]   ;;  %s1832_s3 = inlined_call_operand.vmem [shape: bf16[256,128], index: 3, kind: input, shape index: {}]   ;;  %s1833_s4 = inlined_call_operand.vmem [shape: bf16[512,128], index: 4, kind: input, shape index: {}]   ;;  %s1834_s5 = inlined_call_operand.vmem [shape: f32[1,128], index: 5, kind: input, shape index: {}]   ;;  %s1835_s6 = inlined_call_operand.vmem [shape: bf16[256,128], index: 6, kind: output, shape index: {}]  }
   0x1 LB: > { %s1223_s22 = sadd.s32 4294967295, %s1590_s21   ;;  %p1227_p0 = scmp.ge.s32.totalorder %s1590_s21, 1  ;;  %s1590_s21 = sphi %s1627_s21, %s16_s21  }
   0x2   : > { %p246_p1 = scmp.lt.s32.totalorder %s1590_s21, 3 }
   0x4   : > { %p247_p2 = pnand %p1227_p0, %p246_p1 }
   0x5   : > { %v1520_v0 = vld [vmem:[%s1833_s4 + $0x40] sm:$0xff] (!%p247_p2)   ;;  %v1524_v4 = vld [vmem:[%s1833_s4 + $0x48] sm:$0xff] (!%p247_p2)   ;;  %v1528_v8 = vld [vmem:[%s1833_s4 + $0x50] sm:$0xff] (!%p247_p2)   ;;  %s1228_s9 = sshll.u32 (!%p247_p2), %s1223_s22, 4 }
   0x6   : > { %250 = sbr.rel (%p247_p2) target bundleno = 321 (0x141), region = 44  ;;  %v1521_v1 = vld [vmem:[%s1833_s4 + $0xc0] sm:$0xff] (!%p247_p2)   ;;  %1384 = vmatprep.subr.bf16.mxu0 (!%p247_p2), %v1520_v0  ;;  %v1525_v5 = vld [vmem:[%s1833_s4 + $0xc8] sm:$0xff] (!%p247_p2)   ;;  %v1529_v9 = vld [vmem:[%s1833_s4 + $0xd0] sm:$0xff] (!%p247_p2)   ;;  %p292_p3 = scmp.lt.s32.totalorder (!%p247_p2), %s1228_s9, 31 }
   0x7   : > { %v1522_v2 = vld [vmem:[%s1833_s4] sm:$0xff] (!%p247_p2)   ;;  %1448 = vmatprep.subr.bf16.mxu1 (!%p247_p2), %v1521_v1  ;;  %v1526_v6 = vld [vmem:[%s1833_s4 + $0x8] sm:$0xff] (!%p247_p2)   ;;  %v1530_v10 = vld [vmem:[%s1833_s4 + $0x10] sm:$0xff] (!%p247_p2)  }
   0x8   : > { %v1523_v3 = vld [vmem:[%s1833_s4 + $0x80] sm:$0xff] (!%p247_p2)   ;;  %1385 = vmatpush3.bf16.msra.mxu0 (!%p247_p2), %v1522_v2  ;;  %v1527_v7 = vld [vmem:[%s1833_s4 + $0x88] sm:$0xff] (!%p247_p2)   ;;  %v1531_v11 = vld [vmem:[%s1833_s4 + $0x90] sm:$0xff] (!%p247_p2)  }
   0x9   : > { %1449 = vmatpush3.bf16.msra.mxu1 (!%p247_p2), %v1523_v3  ;;  %1386 = vmatprep.subr.bf16.mxu0 (!%p247_p2), %v1524_v4  ;;  %v1532_v12 = vld [vmem:[%s1833_s4 + $0x58] sm:$0xff] (!%p247_p2)   ;;  %v1536_v16 = vld [vmem:[%s1833_s4 + $0x60] sm:$0xff] (!%p247_p2)   ;;  %v1540_v20 = vld [vmem:[%s1833_s4 + $0x68] sm:$0xff] (!%p247_p2)  }
   0xa   : > { %1450 = vmatprep.subr.bf16.mxu1 (!%p247_p2), %v1525_v5  ;;  %v1533_v13 = vld [vmem:[%s1833_s4 + $0xd8] sm:$0xff] (!%p247_p2)   ;;  %v1537_v17 = vld [vmem:[%s1833_s4 + $0xe0] sm:$0xff] (!%p247_p2)   ;;  %v1541_v21 = vld [vmem:[%s1833_s4 + $0xe8] sm:$0xff] (!%p247_p2)  }
   0xb   : > { %v1534_v14 = vld [vmem:[%s1833_s4 + $0x18] sm:$0xff] (!%p247_p2)   ;;  %v1538_v18 = vld [vmem:[%s1833_s4 + $0x20] sm:$0xff] (!%p247_p2)   ;;  %v1542_v22 = vld [vmem:[%s1833_s4 + $0x28] sm:$0xff] (!%p247_p2)  }
   0xc   : > { %1387 = vmatpush3.bf16.msra.mxu0 (!%p247_p2), %v1526_v6  ;;  %v1535_v15 = vld [vmem:[%s1833_s4 + $0x98] sm:$0xff] (!%p247_p2)   ;;  %v1539_v19 = vld [vmem:[%s1833_s4 + $0xa0] sm:$0xff] (!%p247_p2)   ;;  %v1543_v23 = vld [vmem:[%s1833_s4 + $0xa8] sm:$0xff] (!%p247_p2)  }
   0xd   : > { %1451 = vmatpush3.bf16.msra.mxu1 %v1527_v7  ;;  %1388 = vmatprep.subr.bf16.mxu0 %v1528_v8  ;;  %s1837_s9 = smov (!%p292_p3, %s1228_s9), 31  ;;  %v1544_v24 = vld [vmem:[%s1833_s4 + $0x70] sm:$0xff]   ;;  %v1548_v28 = vld [vmem:[%s1833_s4 + $0x78] sm:$0xff]   ;;  %v1794_v2 = vld [vmem:[%s1834_s5] ss:$0 sm:$0xff] }
   0xe   : > { %1452 = vmatprep.subr.bf16.mxu1 %v1529_v9  ;;  %v1545_v25 = vld [vmem:[%s1833_s4 + $0xf0] sm:$0xff]   ;;  %s1718_s10 = sshll.u32 %s1837_s9, 2  ;;  %v1549_v29 = vld [vmem:[%s1833_s4 + $0xf8] sm:$0xff]  }
   0xf   : > { %v1546_v26 = vld [vmem:[%s1833_s4 + $0x30] sm:$0xff]   ;;  %s1733_s22 = scalar_lea.vmem %s1830_s1, %s1718_s10  ;;  %v1550_v30 = vld [vmem:[%s1833_s4 + $0x38] sm:$0xff]   ;;  %s1742_s24 = scalar_lea.vmem %s1832_s3, %s1718_s10 }
  0x10   : > { %1389 = vmatpush3.bf16.msra.mxu0 %v1530_v10  ;;  %v1547_v27 = vld [vmem:[%s1833_s4 + $0xb0] sm:$0xff]   ;;  %v1551_v31 = vld [vmem:[%s1833_s4 + $0xb8] sm:$0xff]   ;;  %s1751_s29 = scalar_lea.vmem %s1829_s0, %s1718_s10  ;;  %v1552_v32 = vld [vmem:[%s1733_s22] sm:$0xff]   ;;  %s1758_s8 = scalar_lea.vmem %s1831_s2, %s1718_s10 }
  0x11   : > { %1453 = vmatpush3.bf16.msra.mxu1 %v1531_v11  ;;  %1390 = vmatprep.subr.bf16.mxu0 %v1532_v12  ;;  %v1553_v33 = vld [vmem:[%s1742_s24] sm:$0xff]   ;;  %v1556_v36 = vld [vmem:[%s1733_s22 + $0x8] sm:$0xff]   ;;  %v1560_v40 = vld [vmem:[%s1733_s22 + $0x10] sm:$0xff]   ;;  %s1802_s15 = scalar_lea.vmem %s1835_s6, %s1718_s10 }
  0x12   : > { %1454 = vmatprep.subr.bf16.mxu1 %v1533_v13  ;;  %873 = vmatprep.mubr.bf16.mxu0 %v1552_v32  ;;  %v1554_v34 = vld [vmem:[%s1751_s29] sm:$0xff]   ;;  %v1557_v37 = vld [vmem:[%s1742_s24 + $0x8] sm:$0xff]   ;;  %v1561_v41 = vld [vmem:[%s1742_s24 + $0x10] sm:$0xff]  }
  0x13   : > { %970 = vmatprep.mubr.bf16.mxu1 %v1553_v33  ;;  %v1555_v35 = vld [vmem:[%s1758_s8] sm:$0xff]   ;;  %v1558_v38 = vld [vmem:[%s1751_s29 + $0x8] sm:$0xff]   ;;  %v1562_v42 = vld [vmem:[%s1751_s29 + $0x10] sm:$0xff]  }
  0x14   : > { %1391 = vmatpush3.bf16.msra.mxu0 %v1534_v14  ;;  %v1559_v39 = vld [vmem:[%s1758_s8 + $0x8] sm:$0xff]   ;;  %v1563_v43 = vld [vmem:[%s1758_s8 + $0x10] sm:$0xff]   ;;  %v1564_v44 = vld [vmem:[%s1733_s22 + $0x18] sm:$0xff]  }
  0x15   : > { %1455 = vmatpush3.bf16.msra.mxu1 %v1535_v15  ;;  %1392 = vmatprep.subr.bf16.mxu0 %v1536_v16  ;;  %v1565_v45 = vld [vmem:[%s1742_s24 + $0x18] sm:$0xff]   ;;  %v1568_v48 = vld [vmem:[%s1733_s22 + $0x20] sm:$0xff]   ;;  %v1572_v52 = vld [vmem:[%s1733_s22 + $0x28] sm:$0xff]  }
  0x16   : > { %1456 = vmatprep.subr.bf16.mxu1 %v1537_v17  ;;  %v1566_v46 = vld [vmem:[%s1751_s29 + $0x18] sm:$0xff]   ;;  %v1569_v49 = vld [vmem:[%s1742_s24 + $0x20] sm:$0xff]   ;;  %v1573_v53 = vld [vmem:[%s1742_s24 + $0x28] sm:$0xff]  }
  0x17   : > { %v1567_v47 = vld [vmem:[%s1758_s8 + $0x18] sm:$0xff]   ;;  %v1570_v50 = vld [vmem:[%s1751_s29 + $0x20] sm:$0xff]   ;;  %v1574_v54 = vld [vmem:[%s1751_s29 + $0x28] sm:$0xff]  }
  0x18   : > { %1393 = vmatpush3.bf16.msra.mxu0 %v1538_v18  ;;  %v1571_v51 = vld [vmem:[%s1758_s8 + $0x20] sm:$0xff]   ;;  %v1575_v55 = vld [vmem:[%s1758_s8 + $0x28] sm:$0xff]   ;;  %v1576_v56 = vld [vmem:[%s1733_s22 + $0x30] sm:$0xff]  }
  0x19   : > { %1457 = vmatpush3.bf16.msra.mxu1 %v1539_v19  ;;  %1394 = vmatprep.subr.bf16.mxu0 %v1540_v20  ;;  %v1577_v57 = vld [vmem:[%s1742_s24 + $0x30] sm:$0xff]   ;;  %v1580_v60 = vld [vmem:[%s1733_s22 + $0x38] sm:$0xff]  }
  0x1a   : > { %1458 = vmatprep.subr.bf16.mxu1 %v1541_v21  ;;  %v1578_v58 = vld [vmem:[%s1751_s29 + $0x30] sm:$0xff]   ;;  %v1581_v61 = vld [vmem:[%s1742_s24 + $0x38] sm:$0xff]  }
  0x1b   : > { %v1579_v59 = vld [vmem:[%s1758_s8 + $0x30] sm:$0xff]   ;;  %v1582_v62 = vld [vmem:[%s1751_s29 + $0x38] sm:$0xff]  }
  0x1c   : > { %1395 = vmatpush3.bf16.msra.mxu0 %v1542_v22  ;;  %v1583_v63 = vld [vmem:[%s1758_s8 + $0x38] sm:$0xff]  }
  0x1d   : > { %1459 = vmatpush3.bf16.msra.mxu1 %v1543_v23  ;;  %1396 = vmatprep.subr.bf16.mxu0 %v1544_v24 }
  0x1e   : > { %1460 = vmatprep.subr.bf16.mxu1 %v1545_v25 }
  0x20   : > { %1397 = vmatpush3.bf16.msra.mxu0 %v1546_v26 }
  0x21   : > { %1461 = vmatpush3.bf16.msra.mxu1 %v1547_v27  ;;  %1398 = vmatprep.subr.bf16.mxu0 %v1548_v28 }
  0x22   : > { %1462 = vmatprep.subr.bf16.mxu1 %v1549_v29 }
  0x24   : > { %1399 = vmatpush3.bf16.msra.mxu0 %v1550_v30 }
  0x25   : > { %1463 = vmatpush3.bf16.msra.mxu1 %v1551_v31 }
  0x27   : > { %874 = vmatmul.mubr.bf16.vlgmr.msra.gmra.mrb[0].mxu0 %v1554_v34 }
  0x28   : > { %971 = vmatmul.mubr.bf16.vlgmr.msra.gmra.mrb[0].mxu1 %v1555_v35  ;;  %881 = vmatprep.mubr.bf16.mxu0 %v1556_v36 }
  0x29   : > { %978 = vmatprep.mubr.bf16.mxu1 %v1557_v37 }
  0x2f   : > { %882 = vmatmul.mubr.bf16.gmra.mrb[4].mxu0 %v1558_v38 }
  0x30   : > { %979 = vmatmul.mubr.bf16.gmra.mrb[4].mxu1 %v1559_v39  ;;  %889 = vmatprep.mubr.bf16.mxu0 %v1560_v40 }
  0x31   : > { %986 = vmatprep.mubr.bf16.mxu1 %v1561_v41 }
  0x37   : > { %890 = vmatmul.mubr.bf16.gmra.mrb[8].mxu0 %v1562_v42 }
  0x38   : > { %987 = vmatmul.mubr.bf16.gmra.mrb[8].mxu1 %v1563_v43  ;;  %897 = vmatprep.mubr.bf16.mxu0 %v1564_v44 }
  0x39   : > { %994 = vmatprep.mubr.bf16.mxu1 %v1565_v45 }
  0x3f   : > { %898 = vmatmul.mubr.bf16.gmra.mrb[12].mxu0 %v1566_v46 }
  0x40   : > { %995 = vmatmul.mubr.bf16.gmra.mrb[12].mxu1 %v1567_v47  ;;  %905 = vmatprep.mubr.bf16.mxu0 %v1568_v48 }
  0x41   : > { %1002 = vmatprep.mubr.bf16.mxu1 %v1569_v49 }
  0x47   : > { %906 = vmatmul.mubr.bf16.gmra.mrb[16].mxu0 %v1570_v50 }
  0x48   : > { %1003 = vmatmul.mubr.bf16.gmra.mrb[16].mxu1 %v1571_v51  ;;  %913 = vmatprep.mubr.bf16.mxu0 %v1572_v52 }
  0x49   : > { %1010 = vmatprep.mubr.bf16.mxu1 %v1573_v53 }
  0x4f   : > { %914 = vmatmul.mubr.bf16.gmra.mrb[20].mxu0 %v1574_v54 }
  0x50   : > { %1011 = vmatmul.mubr.bf16.gmra.mrb[20].mxu1 %v1575_v55  ;;  %921 = vmatprep.mubr.bf16.mxu0 %v1576_v56 }
  0x51   : > { %1018 = vmatprep.mubr.bf16.mxu1 %v1577_v57 }
  0x57   : > { %922 = vmatmul.mubr.bf16.gmra.mrb[24].mxu0 %v1578_v58 }
  0x58   : > { %1019 = vmatmul.mubr.bf16.gmra.mrb[24].mxu1 %v1579_v59  ;;  %929 = vmatprep.mubr.bf16.mxu0 %v1580_v60 }
  0x59   : > { %1026 = vmatprep.mubr.bf16.mxu1 %v1581_v61 }
  0x5f   : > { %930 = vmatmul.mubr.bf16.gmra.mrb[28].mxu0 %v1582_v62 }
  0x60   : > { %1027 = vmatmul.mubr.bf16.gmra.mrb[28].mxu1 %v1583_v63 }
  0xfa   : > { %v1400_v0 = vpop.f32.mrb[0].mxu0 }
  0xfb   : > { %v1464_v1 = vpop.f32.mrb[0].mxu1  ;;  %v1401_v3 = vpop.f32.mrb[1].mxu0 }
  0xfc   : > { %v1402_v4 = vadd.f32 %v1401_v3, %v1400_v0  ;;  %v1465_v5 = vpop.f32.mrb[1].mxu1  ;;  %v1403_v6 = vpop.f32.mrb[2].mxu0 }
  0xfd   : > { %v1466_v7 = vadd.f32 %v1465_v5, %v1464_v1  ;;  %v1467_v8 = vpop.f32.mrb[2].mxu1  ;;  %v1404_v9 = vpop.f32.mrb[3].mxu0 }
  0xfe   : > { %v876_v10 = vadd.f32 %v1402_v4, %v1794_v2  ;;  %v1405_v11 = vadd.f32 %v1404_v9, %v1403_v6  ;;  %v1468_v12 = vpop.f32.mrb[3].mxu1 }
  0xff   : > { %v1469_v13 = vadd.f32 %v1468_v12, %v1467_v8 }
 0x100   : > { %v973_v14 = vadd.f32 %v1466_v7, %v876_v10  ;;  %v879_v15 = vadd.f32 %v1405_v11, %v1794_v2 }
 0x102   : > { %v976_v16 = vadd.f32 %v1469_v13, %v879_v15  ;;  %v1406_v17 = vpop.f32.mrb[4].mxu0  ;;  %v1035_v20 = vmax.f32 %v973_v14, 0.0 }
 0x103   : > { %v1470_v18 = vpop.f32.mrb[4].mxu1  ;;  %v1407_v19 = vpop.f32.mrb[5].mxu0 }
 0x104   : > { %v1036_v21 = vmax.f32 %v976_v16, 0.0  ;;  %v1408_v22 = vadd.f32 %v1407_v19, %v1406_v17  ;;  %v1471_v23 = vpop.f32.mrb[5].mxu1  ;;  %v1409_v24 = vpop.f32.mrb[6].mxu0 }
 0x105   : > { %v1472_v25 = vadd.f32 %v1471_v23, %v1470_v18  ;;  %v1473_v26 = vpop.f32.mrb[6].mxu1  ;;  %v1410_v27 = vpop.f32.mrb[7].mxu0 }
 0x106   : > { %v1340_v28 = vpack.c.bf16 %v1036_v21, %v1035_v20  ;;  %v884_v29 = vadd.f32 %v1408_v22, %v1794_v2  ;;  %v1411_v30 = vadd.f32 %v1410_v27, %v1409_v24  ;;  %v1474_v31 = vpop.f32.mrb[7].mxu1 }
 0x107   : > { %v1475_v32 = vadd.f32 %v1474_v31, %v1473_v26 }
 0x108   : > { %1341 = vst [vmem:[%s1802_s15] sm:$0xff] %v1340_v28   ;;  %v981_v33 = vadd.f32 %v1472_v25, %v884_v29  ;;  %v887_v34 = vadd.f32 %v1411_v30, %v1794_v2 }
 0x10a   : > { %v984_v35 = vadd.f32 %v1475_v32, %v887_v34  ;;  %v1412_v36 = vpop.f32.mrb[8].mxu0  ;;  %v1037_v39 = vmax.f32 %v981_v33, 0.0 }
 0x10b   : > { %v1476_v37 = vpop.f32.mrb[8].mxu1  ;;  %v1413_v38 = vpop.f32.mrb[9].mxu0 }
 0x10c   : > { %v1038_v40 = vmax.f32 %v984_v35, 0.0  ;;  %v1414_v41 = vadd.f32 %v1413_v38, %v1412_v36  ;;  %v1477_v42 = vpop.f32.mrb[9].mxu1  ;;  %v1415_v43 = vpop.f32.mrb[10].mxu0 }
 0x10d   : > { %v1478_v44 = vadd.f32 %v1477_v42, %v1476_v37  ;;  %v1479_v45 = vpop.f32.mrb[10].mxu1  ;;  %v1416_v46 = vpop.f32.mrb[11].mxu0 }
 0x10e   : > { %v1345_v47 = vpack.c.bf16 %v1038_v40, %v1037_v39  ;;  %v892_v48 = vadd.f32 %v1414_v41, %v1794_v2  ;;  %v1417_v49 = vadd.f32 %v1416_v46, %v1415_v43  ;;  %v1480_v50 = vpop.f32.mrb[11].mxu1 }
 0x10f   : > { %v1481_v51 = vadd.f32 %v1480_v50, %v1479_v45 }
 0x110   : > { %1377 = vst [vmem:[%s1802_s15 + $0x8] sm:$0xff] %v1345_v47   ;;  %v989_v52 = vadd.f32 %v1478_v44, %v892_v48  ;;  %v895_v53 = vadd.f32 %v1417_v49, %v1794_v2 }
 0x112   : > { %v992_v54 = vadd.f32 %v1481_v51, %v895_v53  ;;  %v1418_v55 = vpop.f32.mrb[12].mxu0  ;;  %v1039_v58 = vmax.f32 %v989_v52, 0.0 }
 0x113   : > { %v1482_v56 = vpop.f32.mrb[12].mxu1  ;;  %v1419_v57 = vpop.f32.mrb[13].mxu0 }
 0x114   : > { %v1040_v59 = vmax.f32 %v992_v54, 0.0  ;;  %v1420_v60 = vadd.f32 %v1419_v57, %v1418_v55  ;;  %v1483_v61 = vpop.f32.mrb[13].mxu1  ;;  %v1421_v62 = vpop.f32.mrb[14].mxu0 }
 0x115   : > { %v1484_v63 = vadd.f32 %v1483_v61, %v1482_v56  ;;  %v1485_v0 = vpop.f32.mrb[14].mxu1  ;;  %v1422_v1 = vpop.f32.mrb[15].mxu0 }
 0x116   : > { %v1350_v3 = vpack.c.bf16 %v1040_v59, %v1039_v58  ;;  %v900_v4 = vadd.f32 %v1420_v60, %v1794_v2  ;;  %v1423_v5 = vadd.f32 %v1422_v1, %v1421_v62  ;;  %v1486_v6 = vpop.f32.mrb[15].mxu1 }
 0x117   : > { %v1487_v7 = vadd.f32 %v1486_v6, %v1485_v0 }
 0x118   : > { %1378 = vst [vmem:[%s1802_s15 + $0x10] sm:$0xff] %v1350_v3   ;;  %v997_v8 = vadd.f32 %v1484_v63, %v900_v4  ;;  %v903_v9 = vadd.f32 %v1423_v5, %v1794_v2 }
 0x11a   : > { %v1000_v10 = vadd.f32 %v1487_v7, %v903_v9  ;;  %v1424_v11 = vpop.f32.mrb[16].mxu0  ;;  %v1041_v14 = vmax.f32 %v997_v8, 0.0 }
 0x11b   : > { %v1488_v12 = vpop.f32.mrb[16].mxu1  ;;  %v1425_v13 = vpop.f32.mrb[17].mxu0 }
 0x11c   : > { %v1042_v15 = vmax.f32 %v1000_v10, 0.0  ;;  %v1426_v16 = vadd.f32 %v1425_v13, %v1424_v11  ;;  %v1489_v17 = vpop.f32.mrb[17].mxu1  ;;  %v1427_v18 = vpop.f32.mrb[18].mxu0 }
 0x11d   : > { %v1490_v19 = vadd.f32 %v1489_v17, %v1488_v12  ;;  %v1491_v20 = vpop.f32.mrb[18].mxu1  ;;  %v1428_v21 = vpop.f32.mrb[19].mxu0 }
 0x11e   : > { %v1355_v22 = vpack.c.bf16 %v1042_v15, %v1041_v14  ;;  %v908_v23 = vadd.f32 %v1426_v16, %v1794_v2  ;;  %v1429_v24 = vadd.f32 %v1428_v21, %v1427_v18  ;;  %v1492_v25 = vpop.f32.mrb[19].mxu1 }
 0x11f   : > { %v1493_v26 = vadd.f32 %v1492_v25, %v1491_v20 }
 0x120   : > { %1379 = vst [vmem:[%s1802_s15 + $0x18] sm:$0xff] %v1355_v22   ;;  %v1005_v27 = vadd.f32 %v1490_v19, %v908_v23  ;;  %v911_v28 = vadd.f32 %v1429_v24, %v1794_v2 }
 0x122   : > { %v1008_v29 = vadd.f32 %v1493_v26, %v911_v28  ;;  %v1430_v30 = vpop.f32.mrb[20].mxu0  ;;  %v1043_v33 = vmax.f32 %v1005_v27, 0.0 }
 0x123   : > { %v1494_v31 = vpop.f32.mrb[20].mxu1  ;;  %v1431_v32 = vpop.f32.mrb[21].mxu0 }
 0x124   : > { %v1044_v34 = vmax.f32 %v1008_v29, 0.0  ;;  %v1432_v35 = vadd.f32 %v1431_v32, %v1430_v30  ;;  %v1495_v36 = vpop.f32.mrb[21].mxu1  ;;  %v1433_v37 = vpop.f32.mrb[22].mxu0 }
 0x125   : > { %v1496_v38 = vadd.f32 %v1495_v36, %v1494_v31  ;;  %v1497_v39 = vpop.f32.mrb[22].mxu1  ;;  %v1434_v40 = vpop.f32.mrb[23].mxu0 }
 0x126   : > { %v1360_v41 = vpack.c.bf16 %v1044_v34, %v1043_v33  ;;  %v916_v42 = vadd.f32 %v1432_v35, %v1794_v2  ;;  %v1435_v43 = vadd.f32 %v1434_v40, %v1433_v37  ;;  %v1498_v44 = vpop.f32.mrb[23].mxu1 }
 0x127   : > { %v1499_v45 = vadd.f32 %v1498_v44, %v1497_v39 }
 0x128   : > { %1380 = vst [vmem:[%s1802_s15 + $0x20] sm:$0xff] %v1360_v41   ;;  %v1013_v46 = vadd.f32 %v1496_v38, %v916_v42  ;;  %v919_v47 = vadd.f32 %v1435_v43, %v1794_v2 }
 0x12a   : > { %v1016_v48 = vadd.f32 %v1499_v45, %v919_v47  ;;  %v1436_v49 = vpop.f32.mrb[24].mxu0  ;;  %v1045_v52 = vmax.f32 %v1013_v46, 0.0 }
 0x12b   : > { %v1500_v50 = vpop.f32.mrb[24].mxu1  ;;  %v1437_v51 = vpop.f32.mrb[25].mxu0 }
 0x12c   : > { %v1046_v53 = vmax.f32 %v1016_v48, 0.0  ;;  %v1438_v54 = vadd.f32 %v1437_v51, %v1436_v49  ;;  %v1501_v55 = vpop.f32.mrb[25].mxu1  ;;  %v1439_v56 = vpop.f32.mrb[26].mxu0 }
 0x12d   : > { %v1502_v57 = vadd.f32 %v1501_v55, %v1500_v50  ;;  %v1503_v58 = vpop.f32.mrb[26].mxu1  ;;  %v1440_v59 = vpop.f32.mrb[27].mxu0 }
 0x12e   : > { %v1365_v60 = vpack.c.bf16 %v1046_v53, %v1045_v52  ;;  %v924_v61 = vadd.f32 %v1438_v54, %v1794_v2  ;;  %v1441_v62 = vadd.f32 %v1440_v59, %v1439_v56  ;;  %v1504_v63 = vpop.f32.mrb[27].mxu1 }
 0x12f   : > { %v1505_v0 = vadd.f32 %v1504_v63, %v1503_v58 }
 0x130   : > { %1381 = vst [vmem:[%s1802_s15 + $0x28] sm:$0xff] %v1365_v60   ;;  %v1021_v1 = vadd.f32 %v1502_v57, %v924_v61  ;;  %v927_v3 = vadd.f32 %v1441_v62, %v1794_v2 }
 0x132   : > { %v1024_v4 = vadd.f32 %v1505_v0, %v927_v3  ;;  %v1442_v5 = vpop.f32.mrb[28].mxu0  ;;  %v1047_v8 = vmax.f32 %v1021_v1, 0.0 }
 0x133   : > { %v1506_v6 = vpop.f32.mrb[28].mxu1  ;;  %v1443_v7 = vpop.f32.mrb[29].mxu0 }
 0x134   : > { %v1048_v9 = vmax.f32 %v1024_v4, 0.0  ;;  %v1444_v10 = vadd.f32 %v1443_v7, %v1442_v5  ;;  %v1507_v11 = vpop.f32.mrb[29].mxu1  ;;  %v1445_v12 = vpop.f32.mrb[30].mxu0 }
 0x135   : > { %v1508_v13 = vadd.f32 %v1507_v11, %v1506_v6  ;;  %v1509_v14 = vpop.f32.mrb[30].mxu1  ;;  %v1446_v15 = vpop.f32.mrb[31].mxu0 }
 0x136   : > { %v1370_v16 = vpack.c.bf16 %v1048_v9, %v1047_v8  ;;  %v932_v17 = vadd.f32 %v1444_v10, %v1794_v2  ;;  %v1447_v18 = vadd.f32 %v1446_v15, %v1445_v12  ;;  %v1510_v19 = vpop.f32.mrb[31].mxu1 }
 0x137   : > { %v1511_v20 = vadd.f32 %v1510_v19, %v1509_v14 }
 0x138   : > { %1382 = vst [vmem:[%s1802_s15 + $0x30] sm:$0xff] %v1370_v16   ;;  %v1029_v21 = vadd.f32 %v1508_v13, %v932_v17  ;;  %v935_v22 = vadd.f32 %v1447_v18, %v1794_v2 }
 0x13a   : > { %v1032_v23 = vadd.f32 %v1511_v20, %v935_v22  ;;  %v1049_v24 = vmax.f32 %v1029_v21, 0.0 }
 0x13c   : > { %v1050_v25 = vmax.f32 %v1032_v23, 0.0 }
 0x13e   : > { %v1375_v26 = vpack.c.bf16 %v1050_v25, %v1049_v24 }
 0x140   : > { %1383 = vst [vmem:[%s1802_s15 + $0x38] sm:$0xff] %v1375_v26  }
 0x141 PF: > { %s16_s21 = sadd.s32 1, %s1590_s21  }
 0x142   : > { %p13_p4 = scmp.ge.s32.totalorder %s16_s21, 4  }
 0x144   :  { %15 = sbr.rel (!%p13_p4) target bundleno = 1 (0x1), region = 83 }

// kernel: forward.17
= control target key start
LH: loop header
LB: loop body
LE: loop exit
PB: predicated region body
PF: predicated region fallthrough
CT: control target
= control target key end

     0   :  { %s2463_s21 = smov 0   ;;  %s2769_s0 = inlined_call_operand.vmem [shape: bf16[256,128], index: 0, kind: input, shape index: {}]   ;;  %s2770_s1 = inlined_call_operand.vmem [shape: bf16[256,128], index: 1, kind: input, shape index: {}]   ;;  %s2771_s2 = inlined_call_operand.vmem [shape: bf16[256,128], index: 2, kind: input, shape index: {}]   ;;  %s2772_s3 = inlined_call_operand.vmem [shape: bf16[256,128], index: 3, kind: input, shape index: {}]   ;;  %s2773_s4 = inlined_call_operand.vmem [shape: bf16[512,128], index: 4, kind: input, shape index: {}]   ;;  %s2774_s5 = inlined_call_operand.vmem [shape: f32[1,128], index: 5, kind: input, shape index: {}]   ;;  %s2775_s6 = inlined_call_operand.vmem [shape: bf16[128,128], index: 6, kind: input, shape index: {}]   ;;  %s2776_s7 = inlined_call_operand.vmem [shape: f32[1,128], index: 7, kind: input, shape index: {}]   ;;  %s2777_s8 = inlined_call_operand.vmem [shape: bf16[128,128], index: 8, kind: input, shape index: {}]   ;;  %s2778_s9 = inlined_call_operand.vmem [shape: f32[1,128], index: 9, kind: input, shape index: {}]   ;;  %s2779_s10 = inlined_call_operand.vmem [shape: bf16[128,128], index: 10, kind: input, shape index: {}]   ;;  %s2780_s11 = inlined_call_operand.vmem [shape: f32[1,128], index: 11, kind: input, shape index: {}]   ;;  %s2781_s12 = inlined_call_operand.vmem [shape: f32[256,128], index: 12, kind: output, shape index: {}]  }
   0x1 LB: > { %s1897_s22 = sadd.s32 4294967295, %s2396_s21   ;;  %p1901_p0 = scmp.ge.s32.totalorder %s2396_s21, 1  ;;  %s2396_s21 = sphi %s2463_s21, %s22_s21  }
   0x2   : > { %p396_p1 = scmp.lt.s32.totalorder %s2396_s21, 3 }
   0x4   : > { %p397_p2 = pnand %p1901_p0, %p396_p1 }
   0x5   : > { %v2302_v0 = vld [vmem:[%s2773_s4 + $0x40] sm:$0xff] (!%p397_p2)   ;;  %v2306_v4 = vld [vmem:[%s2773_s4 + $0x48] sm:$0xff] (!%p397_p2)   ;;  %v2310_v8 = vld [vmem:[%s2773_s4 + $0x50] sm:$0xff] (!%p397_p2)   ;;  %s1902_s23 = sshll.u32 (!%p397_p2), %s1897_s22, 4 }
   0x6   : > { %400 = sbr.rel (%p397_p2) target bundleno = 984 (0x3d8), region = 68  ;;  %v2303_v1 = vld [vmem:[%s2773_s4 + $0xc0] sm:$0xff] (!%p397_p2)   ;;  %2006 = vmatprep.subr.bf16.mxu0 (!%p397_p2), %v2302_v0  ;;  %v2307_v5 = vld [vmem:[%s2773_s4 + $0xc8] sm:$0xff] (!%p397_p2)   ;;  %v2311_v9 = vld [vmem:[%s2773_s4 + $0xd0] sm:$0xff] (!%p397_p2)   ;;  %p454_p3 = scmp.lt.s32.totalorder (!%p397_p2), %s1902_s23, 31 }
   0x7   : > { %v2304_v2 = vld [vmem:[%s2773_s4] sm:$0xff] (!%p397_p2)   ;;  %2070 = vmatprep.subr.bf16.mxu1 (!%p397_p2), %v2303_v1  ;;  %v2308_v6 = vld [vmem:[%s2773_s4 + $0x8] sm:$0xff] (!%p397_p2)   ;;  %v2312_v10 = vld [vmem:[%s2773_s4 + $0x10] sm:$0xff] (!%p397_p2)  }
   0x8   : > { %v2305_v3 = vld [vmem:[%s2773_s4 + $0x80] sm:$0xff] (!%p397_p2)   ;;  %2007 = vmatpush3.bf16.msra.mxu0 (!%p397_p2), %v2304_v2  ;;  %v2309_v7 = vld [vmem:[%s2773_s4 + $0x88] sm:$0xff] (!%p397_p2)   ;;  %v2313_v11 = vld [vmem:[%s2773_s4 + $0x90] sm:$0xff] (!%p397_p2)  }
   0x9   : > { %2071 = vmatpush3.bf16.msra.mxu1 (!%p397_p2), %v2305_v3  ;;  %2008 = vmatprep.subr.bf16.mxu0 (!%p397_p2), %v2306_v4  ;;  %v2314_v12 = vld [vmem:[%s2773_s4 + $0x58] sm:$0xff] (!%p397_p2)   ;;  %v2318_v16 = vld [vmem:[%s2773_s4 + $0x60] sm:$0xff] (!%p397_p2)   ;;  %v2322_v20 = vld [vmem:[%s2773_s4 + $0x68] sm:$0xff] (!%p397_p2)  }
   0xa   : > { %2072 = vmatprep.subr.bf16.mxu1 (!%p397_p2), %v2307_v5  ;;  %v2315_v13 = vld [vmem:[%s2773_s4 + $0xd8] sm:$0xff] (!%p397_p2)   ;;  %v2319_v17 = vld [vmem:[%s2773_s4 + $0xe0] sm:$0xff] (!%p397_p2)   ;;  %v2323_v21 = vld [vmem:[%s2773_s4 + $0xe8] sm:$0xff] (!%p397_p2)  }
   0xb   : > { %v2316_v14 = vld [vmem:[%s2773_s4 + $0x18] sm:$0xff] (!%p397_p2)   ;;  %v2320_v18 = vld [vmem:[%s2773_s4 + $0x20] sm:$0xff] (!%p397_p2)   ;;  %v2324_v22 = vld [vmem:[%s2773_s4 + $0x28] sm:$0xff] (!%p397_p2)  }
   0xc   : > { %2009 = vmatpush3.bf16.msra.mxu0 (!%p397_p2), %v2308_v6  ;;  %v2317_v15 = vld [vmem:[%s2773_s4 + $0x98] sm:$0xff] (!%p397_p2)   ;;  %v2321_v19 = vld [vmem:[%s2773_s4 + $0xa0] sm:$0xff] (!%p397_p2)   ;;  %v2325_v23 = vld [vmem:[%s2773_s4 + $0xa8] sm:$0xff] (!%p397_p2)  }
   0xd   : > { %2073 = vmatpush3.bf16.msra.mxu1 %v2309_v7  ;;  %2010 = vmatprep.subr.bf16.mxu0 %v2310_v8  ;;  %s2783_s23 = smov (!%p454_p3, %s1902_s23), 31  ;;  %v2326_v24 = vld [vmem:[%s2773_s4 + $0x70] sm:$0xff]   ;;  %v2330_v28 = vld [vmem:[%s2773_s4 + $0x78] sm:$0xff]   ;;  %v2366_v54 = vld [vmem:[%s2775_s6] sm:$0xff]  }
   0xe   : > { %2074 = vmatprep.subr.bf16.mxu1 %v2311_v9  ;;  %v2327_v25 = vld [vmem:[%s2773_s4 + $0xf0] sm:$0xff]   ;;  %s1903_s30 = sshll.u32 %s2783_s23, 2  ;;  %v2331_v29 = vld [vmem:[%s2773_s4 + $0xf8] sm:$0xff]   ;;  %v2367_v55 = vld [vmem:[%s2775_s6 + $0x8] sm:$0xff]   ;;  %s1911_s22 = sshll.u32 %s2783_s23, 3 }
   0xf   : > { %v2328_v26 = vld [vmem:[%s2773_s4 + $0x30] sm:$0xff]   ;;  %s2569_s20 = scalar_lea.vmem %s2770_s1, %s1903_s30  ;;  %v2332_v30 = vld [vmem:[%s2773_s4 + $0x38] sm:$0xff]   ;;  %s2577_s28 = scalar_lea.vmem %s2772_s3, %s1903_s30  ;;  %v2370_v4 = vld [vmem:[%s2775_s6 + $0x20] sm:$0xff]  }
  0x10   : > { %2011 = vmatpush3.bf16.msra.mxu0 %v2312_v10  ;;  %v2329_v27 = vld [vmem:[%s2773_s4 + $0xb0] sm:$0xff]   ;;  %v2333_v31 = vld [vmem:[%s2773_s4 + $0xb8] sm:$0xff]   ;;  %s2585_s15 = scalar_lea.vmem %s2769_s0, %s1903_s30  ;;  %v2334_v32 = vld [vmem:[%s2569_s20] sm:$0xff]   ;;  %s2591_s18 = scalar_lea.vmem %s2771_s2, %s1903_s30 }
  0x11   : > { %2075 = vmatpush3.bf16.msra.mxu1 %v2313_v11  ;;  %2012 = vmatprep.subr.bf16.mxu0 %v2314_v12  ;;  %v2335_v33 = vld [vmem:[%s2577_s28] sm:$0xff]   ;;  %v2338_v36 = vld [vmem:[%s2569_s20 + $0x8] sm:$0xff]   ;;  %v2342_v40 = vld [vmem:[%s2569_s20 + $0x10] sm:$0xff]  }
  0x12   : > { %2076 = vmatprep.subr.bf16.mxu1 %v2315_v13  ;;  %1035 = vmatprep.mubr.bf16.mxu0 %v2334_v32  ;;  %v2336_v34 = vld [vmem:[%s2585_s15] sm:$0xff]   ;;  %v2339_v37 = vld [vmem:[%s2577_s28 + $0x8] sm:$0xff]   ;;  %v2343_v41 = vld [vmem:[%s2577_s28 + $0x10] sm:$0xff]  }
  0x13   : > { %1132 = vmatprep.mubr.bf16.mxu1 %v2335_v33  ;;  %v2337_v35 = vld [vmem:[%s2591_s18] sm:$0xff]   ;;  %v2340_v38 = vld [vmem:[%s2585_s15 + $0x8] sm:$0xff]   ;;  %v2344_v42 = vld [vmem:[%s2585_s15 + $0x10] sm:$0xff]  }
  0x14   : > { %2013 = vmatpush3.bf16.msra.mxu0 %v2316_v14  ;;  %v2341_v39 = vld [vmem:[%s2591_s18 + $0x8] sm:$0xff]   ;;  %v2345_v43 = vld [vmem:[%s2591_s18 + $0x10] sm:$0xff]   ;;  %v2346_v44 = vld [vmem:[%s2569_s20 + $0x18] sm:$0xff]  }
  0x15   : > { %2077 = vmatpush3.bf16.msra.mxu1 %v2317_v15  ;;  %2014 = vmatprep.subr.bf16.mxu0 %v2318_v16  ;;  %v2347_v45 = vld [vmem:[%s2577_s28 + $0x18] sm:$0xff]   ;;  %v2350_v48 = vld [vmem:[%s2569_s20 + $0x20] sm:$0xff]   ;;  %v2354_v52 = vld [vmem:[%s2569_s20 + $0x28] sm:$0xff]  }
  0x16   : > { %2078 = vmatprep.subr.bf16.mxu1 %v2319_v17  ;;  %v2348_v46 = vld [vmem:[%s2585_s15 + $0x18] sm:$0xff]   ;;  %v2351_v49 = vld [vmem:[%s2577_s28 + $0x20] sm:$0xff]   ;;  %v2355_v53 = vld [vmem:[%s2577_s28 + $0x28] sm:$0xff]  }
  0x17   : > { %v2349_v47 = vld [vmem:[%s2591_s18 + $0x18] sm:$0xff]   ;;  %v2352_v50 = vld [vmem:[%s2585_s15 + $0x20] sm:$0xff]   ;;  %v2368_v56 = vld [vmem:[%s2775_s6 + $0x10] sm:$0xff]  }
  0x18   : > { %2015 = vmatpush3.bf16.msra.mxu0 %v2320_v18  ;;  %v2353_v51 = vld [vmem:[%s2591_s18 + $0x20] sm:$0xff]   ;;  %v2356_v57 = vld [vmem:[%s2585_s15 + $0x28] sm:$0xff]   ;;  %v2358_v59 = vld [vmem:[%s2569_s20 + $0x30] sm:$0xff]  }
  0x19   : > { %2079 = vmatpush3.bf16.msra.mxu1 %v2321_v19  ;;  %2016 = vmatprep.subr.bf16.mxu0 %v2322_v20  ;;  %v2357_v58 = vld [vmem:[%s2591_s18 + $0x28] sm:$0xff]   ;;  %v2359_v60 = vld [vmem:[%s2577_s28 + $0x30] sm:$0xff]   ;;  %v2362_v63 = vld [vmem:[%s2569_s20 + $0x38] sm:$0xff]  }
  0x1a   : > { %2080 = vmatprep.subr.bf16.mxu1 %v2323_v21  ;;  %v2360_v61 = vld [vmem:[%s2585_s15 + $0x30] sm:$0xff]   ;;  %v2363_v0 = vld [vmem:[%s2577_s28 + $0x38] sm:$0xff]   ;;  %v2371_v5 = vld [vmem:[%s2775_s6 + $0x28] sm:$0xff]   ;;  %s2748_s28 = scalar_lea.vmem %s2781_s12, %s1911_s22 }
  0x1b   : > { %v2361_v62 = vld [vmem:[%s2591_s18 + $0x30] sm:$0xff]   ;;  %v2364_v1 = vld [vmem:[%s2585_s15 + $0x38] sm:$0xff]   ;;  %v2374_v8 = vld [vmem:[%s2777_s8] sm:$0xff]  }
  0x1c   : > { %2017 = vmatpush3.bf16.msra.mxu0 %v2324_v22  ;;  %v2365_v2 = vld [vmem:[%s2591_s18 + $0x38] sm:$0xff]   ;;  %v2372_v6 = vld [vmem:[%s2775_s6 + $0x30] sm:$0xff]   ;;  %v2375_v9 = vld [vmem:[%s2777_s8 + $0x8] sm:$0xff]  }
  0x1d   : > { %2081 = vmatpush3.bf16.msra.mxu1 %v2325_v23  ;;  %2018 = vmatprep.subr.bf16.mxu0 %v2326_v24  ;;  %v2369_v3 = vld [vmem:[%s2775_s6 + $0x18] sm:$0xff]   ;;  %v2376_v10 = vld [vmem:[%s2777_s8 + $0x10] sm:$0xff]   ;;  %v2378_v12 = vld [vmem:[%s2777_s8 + $0x20] sm:$0xff]  }
  0x1e   : > { %2082 = vmatprep.subr.bf16.mxu1 %v2327_v25  ;;  %v2373_v7 = vld [vmem:[%s2775_s6 + $0x38] sm:$0xff]   ;;  %v2379_v13 = vld [vmem:[%s2777_s8 + $0x28] sm:$0xff]   ;;  %v2669_v16 = vld [vmem:[%s2774_s5] ss:$0 sm:$0xff] }
  0x1f   : > { %v2377_v11 = vld [vmem:[%s2777_s8 + $0x18] sm:$0xff]  }
  0x20   : > { %2019 = vmatpush3.bf16.msra.mxu0 %v2328_v26 }
  0x21   : > { %2083 = vmatpush3.bf16.msra.mxu1 %v2329_v27  ;;  %2020 = vmatprep.subr.bf16.mxu0 %v2330_v28 }
  0x22   : > { %2084 = vmatprep.subr.bf16.mxu1 %v2331_v29 }
  0x24   : > { %2021 = vmatpush3.bf16.msra.mxu0 %v2332_v30 }
  0x25   : > { %2085 = vmatpush3.bf16.msra.mxu1 %v2333_v31  ;;  %2182 = vmatprep.subr.bf16.mxu0 %v2366_v54 }
  0x26   : > { %2214 = vmatprep.subr.bf16.mxu1 %v2374_v8 }
  0x27   : > { %1036 = vmatmul.mubr.bf16.vlgmr.msra.gmra.mrb[0].mxu0 %v2336_v34 }
  0x28   : > { %1133 = vmatmul.mubr.bf16.vlgmr.msra.gmra.mrb[0].mxu1 %v2337_v35  ;;  %1043 = vmatprep.mubr.bf16.mxu0 %v2338_v36 }
  0x29   : > { %1140 = vmatprep.mubr.bf16.mxu1 %v2339_v37  ;;  %2183 = vmatpush3.bf16.msra.mxu0 %v2366_v54 }
  0x2a   : > { %2184 = vmatprep.subr.bf16.mxu0 %v2367_v55  ;;  %2215 = vmatpush3.bf16.msra.mxu1 %v2374_v8 }
  0x2b   : > { %2216 = vmatprep.subr.bf16.mxu1 %v2375_v9 }
  0x2d   : > { %2185 = vmatpush3.bf16.msra.mxu0 %v2367_v55 }
  0x2e   : > { %2186 = vmatprep.subr.bf16.mxu0 %v2368_v56  ;;  %2217 = vmatpush3.bf16.msra.mxu1 %v2375_v9 }
  0x2f   : > { %1044 = vmatmul.mubr.bf16.gmra.mrb[4].mxu0 %v2340_v38  ;;  %2218 = vmatprep.subr.bf16.mxu1 %v2376_v10 }
  0x30   : > { %1141 = vmatmul.mubr.bf16.gmra.mrb[4].mxu1 %v2341_v39  ;;  %1051 = vmatprep.mubr.bf16.mxu0 %v2342_v40 }
  0x31   : > { %1148 = vmatprep.mubr.bf16.mxu1 %v2343_v41  ;;  %2187 = vmatpush3.bf16.msra.mxu0 %v2368_v56 }
  0x32   : > { %2188 = vmatprep.subr.bf16.mxu0 %v2369_v3  ;;  %2219 = vmatpush3.bf16.msra.mxu1 %v2376_v10 }
  0x33   : > { %2220 = vmatprep.subr.bf16.mxu1 %v2377_v11 }
  0x35   : > { %2189 = vmatpush3.bf16.msra.mxu0 %v2369_v3 }
  0x36   : > { %2190 = vmatprep.subr.bf16.mxu0 %v2370_v4  ;;  %2221 = vmatpush3.bf16.msra.mxu1 %v2377_v11 }
  0x37   : > { %1052 = vmatmul.mubr.bf16.gmra.mrb[8].mxu0 %v2344_v42  ;;  %2222 = vmatprep.subr.bf16.mxu1 %v2378_v12 }
  0x38   : > { %1149 = vmatmul.mubr.bf16.gmra.mrb[8].mxu1 %v2345_v43  ;;  %1059 = vmatprep.mubr.bf16.mxu0 %v2346_v44 }
  0x39   : > { %1156 = vmatprep.mubr.bf16.mxu1 %v2347_v45  ;;  %2191 = vmatpush3.bf16.msra.mxu0 %v2370_v4 }
  0x3a   : > { %2192 = vmatprep.subr.bf16.mxu0 %v2371_v5  ;;  %2223 = vmatpush3.bf16.msra.mxu1 %v2378_v12 }
  0x3b   : > { %2224 = vmatprep.subr.bf16.mxu1 %v2379_v13 }
  0x3d   : > { %2193 = vmatpush3.bf16.msra.mxu0 %v2371_v5 }
  0x3e   : > { %2194 = vmatprep.subr.bf16.mxu0 %v2372_v6  ;;  %2225 = vmatpush3.bf16.msra.mxu1 %v2379_v13 }
  0x3f   : > { %1060 = vmatmul.mubr.bf16.gmra.mrb[12].mxu0 %v2348_v46 }
  0x40   : > { %1157 = vmatmul.mubr.bf16.gmra.mrb[12].mxu1 %v2349_v47  ;;  %1067 = vmatprep.mubr.bf16.mxu0 %v2350_v48 }
  0x41   : > { %1164 = vmatprep.mubr.bf16.mxu1 %v2351_v49  ;;  %2195 = vmatpush3.bf16.msra.mxu0 %v2372_v6 }
  0x42   : > { %2196 = vmatprep.subr.bf16.mxu0 %v2373_v7 }
  0x45   : > { %2197 = vmatpush3.bf16.msra.mxu0 %v2373_v7 }
  0x47   : > { %1068 = vmatmul.mubr.bf16.gmra.mrb[16].mxu0 %v2352_v50 }
  0x48   : > { %1165 = vmatmul.mubr.bf16.gmra.mrb[16].mxu1 %v2353_v51  ;;  %1075 = vmatprep.mubr.bf16.mxu0 %v2354_v52 }
  0x49   : > { %1172 = vmatprep.mubr.bf16.mxu1 %v2355_v53 }
  0x4f   : > { %1076 = vmatmul.mubr.bf16.gmra.mrb[20].mxu0 %v2356_v57 }
  0x50   : > { %1173 = vmatmul.mubr.bf16.gmra.mrb[20].mxu1 %v2357_v58  ;;  %1083 = vmatprep.mubr.bf16.mxu0 %v2358_v59 }
  0x51   : > { %1180 = vmatprep.mubr.bf16.mxu1 %v2359_v60 }
  0x57   : > { %1084 = vmatmul.mubr.bf16.gmra.mrb[24].mxu0 %v2360_v61 }
  0x58   : > { %1181 = vmatmul.mubr.bf16.gmra.mrb[24].mxu1 %v2361_v62  ;;  %1091 = vmatprep.mubr.bf16.mxu0 %v2362_v63 }
  0x59   : > { %1188 = vmatprep.mubr.bf16.mxu1 %v2363_v0 }
  0x5f   : > { %1092 = vmatmul.mubr.bf16.gmra.mrb[28].mxu0 %v2364_v1 }
  0x60   : > { %1189 = vmatmul.mubr.bf16.gmra.mrb[28].mxu1 %v2365_v2 }
  0xfa   : > { %v2022_v14 = vpop.f32.mrb[0].mxu0 }
  0xfb   : > { %v2086_v15 = vpop.f32.mrb[0].mxu1  ;;  %v2023_v17 = vpop.f32.mrb[1].mxu0 }
  0xfc   : > { %v2024_v18 = vadd.f32 %v2023_v17, %v2022_v14  ;;  %v2087_v19 = vpop.f32.mrb[1].mxu1  ;;  %v2025_v20 = vpop.f32.mrb[2].mxu0 }
  0xfd   : > { %v2088_v21 = vadd.f32 %v2087_v19, %v2086_v15  ;;  %v2089_v22 = vpop.f32.mrb[2].mxu1  ;;  %v2026_v23 = vpop.f32.mrb[3].mxu0 }
  0xfe   : > { %v1038_v24 = vadd.f32 %v2024_v18, %v2669_v16  ;;  %v2027_v25 = vadd.f32 %v2026_v23, %v2025_v20  ;;  %v2090_v26 = vpop.f32.mrb[3].mxu1 }
  0xff   : > { %v2091_v27 = vadd.f32 %v2090_v26, %v2089_v22 }
 0x100   : > { %v1135_v28 = vadd.f32 %v2088_v21, %v1038_v24  ;;  %v1041_v29 = vadd.f32 %v2027_v25, %v2669_v16 }
 0x102   : > { %v1138_v30 = vadd.f32 %v2091_v27, %v1041_v29  ;;  %v2028_v31 = vpop.f32.mrb[4].mxu0  ;;  %v1197_v34 = vmax.f32 %v1135_v28, 0.0 }
 0x103   : > { %v2092_v32 = vpop.f32.mrb[4].mxu1  ;;  %v2029_v33 = vpop.f32.mrb[5].mxu0 }
 0x104   : > { %v1198_v35 = vmax.f32 %v1138_v30, 0.0  ;;  %v2030_v36 = vadd.f32 %v2029_v33, %v2028_v31  ;;  %v2093_v37 = vpop.f32.mrb[5].mxu1  ;;  %v2031_v38 = vpop.f32.mrb[6].mxu0 }
 0x105   : > { %v2094_v39 = vadd.f32 %v2093_v37, %v2092_v32  ;;  %v2095_v40 = vpop.f32.mrb[6].mxu1  ;;  %v2032_v41 = vpop.f32.mrb[7].mxu0 }
 0x106   : > { %v1046_v42 = vadd.f32 %v2030_v36, %v2669_v16  ;;  %v2033_v43 = vadd.f32 %v2032_v41, %v2031_v38  ;;  %v2096_v44 = vpop.f32.mrb[7].mxu1  ;;  %v1230_v45 = vpack.c.bf16 %v1198_v35, %v1197_v34 }
 0x107   : > { %v2097_v46 = vadd.f32 %v2096_v44, %v2095_v40 }
 0x108   : > { %v1143_v47 = vadd.f32 %v2094_v39, %v1046_v42  ;;  %v1049_v48 = vadd.f32 %v2033_v43, %v2669_v16  ;;  %2198 = vmatprep.mubr.bf16.mxu0 %v1230_v45 }
 0x10a   : > { %v1146_v49 = vadd.f32 %v2097_v46, %v1049_v48  ;;  %v2034_v50 = vpop.f32.mrb[8].mxu0  ;;  %v1199_v53 = vmax.f32 %v1143_v47, 0.0 }
 0x10b   : > { %v2098_v51 = vpop.f32.mrb[8].mxu1  ;;  %v2035_v52 = vpop.f32.mrb[9].mxu0 }
 0x10c   : > { %v1200_v54 = vmax.f32 %v1146_v49, 0.0  ;;  %v2036_v55 = vadd.f32 %v2035_v52, %v2034_v50  ;;  %v2099_v56 = vpop.f32.mrb[9].mxu1  ;;  %v2037_v57 = vpop.f32.mrb[10].mxu0 }
 0x10d   : > { %v2100_v58 = vadd.f32 %v2099_v56, %v2098_v51  ;;  %v2101_v59 = vpop.f32.mrb[10].mxu1  ;;  %v2038_v60 = vpop.f32.mrb[11].mxu0 }
 0x10e   : > { %v1231_v61 = vpack.c.bf16 %v1200_v54, %v1199_v53  ;;  %v1054_v62 = vadd.f32 %v2036_v55, %v2669_v16  ;;  %v2039_v63 = vadd.f32 %v2038_v60, %v2037_v57  ;;  %v2102_v0 = vpop.f32.mrb[11].mxu1 }
 0x10f   : > { %v2103_v1 = vadd.f32 %v2102_v0, %v2101_v59 }
 0x110   : > { %v1151_v2 = vadd.f32 %v2100_v58, %v1054_v62  ;;  %v1057_v3 = vadd.f32 %v2039_v63, %v2669_v16  ;;  %2199 = vmatmul.mubr.bf16.vlgmr.msra.gmra.mrb[32].mxu0 %v1231_v61 }
 0x112   : > { %v1154_v4 = vadd.f32 %v2103_v1, %v1057_v3  ;;  %v2040_v5 = vpop.f32.mrb[12].mxu0  ;;  %v1201_v8 = vmax.f32 %v1151_v2, 0.0 }
 0x113   : > { %v2104_v6 = vpop.f32.mrb[12].mxu1  ;;  %v2041_v7 = vpop.f32.mrb[13].mxu0 }
 0x114   : > { %v1202_v9 = vmax.f32 %v1154_v4, 0.0  ;;  %v2042_v10 = vadd.f32 %v2041_v7, %v2040_v5  ;;  %v2105_v11 = vpop.f32.mrb[13].mxu1  ;;  %v2043_v12 = vpop.f32.mrb[14].mxu0 }
 0x115   : > { %v2106_v13 = vadd.f32 %v2105_v11, %v2104_v6  ;;  %v2107_v14 = vpop.f32.mrb[14].mxu1  ;;  %v2044_v15 = vpop.f32.mrb[15].mxu0 }
 0x116   : > { %v1062_v17 = vadd.f32 %v2042_v10, %v2669_v16  ;;  %v2045_v18 = vadd.f32 %v2044_v15, %v2043_v12  ;;  %v2108_v19 = vpop.f32.mrb[15].mxu1  ;;  %v1232_v20 = vpack.c.bf16 %v1202_v9, %v1201_v8 }
 0x117   : > { %v2109_v21 = vadd.f32 %v2108_v19, %v2107_v14 }
 0x118   : > { %v1159_v22 = vadd.f32 %v2106_v13, %v1062_v17  ;;  %v1065_v23 = vadd.f32 %v2045_v18, %v2669_v16  ;;  %2202 = vmatprep.mubr.bf16.mxu0 %v1232_v20 }
 0x11a   : > { %v1162_v24 = vadd.f32 %v2109_v21, %v1065_v23  ;;  %v2046_v25 = vpop.f32.mrb[16].mxu0  ;;  %v1203_v28 = vmax.f32 %v1159_v22, 0.0 }
 0x11b   : > { %v2110_v26 = vpop.f32.mrb[16].mxu1  ;;  %v2047_v27 = vpop.f32.mrb[17].mxu0 }
 0x11c   : > { %v1204_v29 = vmax.f32 %v1162_v24, 0.0  ;;  %v2048_v30 = vadd.f32 %v2047_v27, %v2046_v25  ;;  %v2111_v31 = vpop.f32.mrb[17].mxu1  ;;  %v2049_v32 = vpop.f32.mrb[18].mxu0 }
 0x11d   : > { %v2112_v33 = vadd.f32 %v2111_v31, %v2110_v26  ;;  %v2113_v34 = vpop.f32.mrb[18].mxu1  ;;  %v2050_v35 = vpop.f32.mrb[19].mxu0 }
 0x11e   : > { %v1070_v36 = vadd.f32 %v2048_v30, %v2669_v16  ;;  %v2051_v37 = vadd.f32 %v2050_v35, %v2049_v32  ;;  %v2114_v38 = vpop.f32.mrb[19].mxu1  ;;  %v1233_v39 = vpack.c.bf16 %v1204_v29, %v1203_v28 }
 0x11f   : > { %v2115_v40 = vadd.f32 %v2114_v38, %v2113_v34 }
 0x120   : > { %v1167_v41 = vadd.f32 %v2112_v33, %v1070_v36  ;;  %v1073_v42 = vadd.f32 %v2051_v37, %v2669_v16  ;;  %2203 = vmatmul.mubr.bf16.gmra.mrb[36].mxu0 %v1233_v39 }
 0x122   : > { %v1170_v43 = vadd.f32 %v2115_v40, %v1073_v42  ;;  %v2052_v44 = vpop.f32.mrb[20].mxu0  ;;  %v1205_v47 = vmax.f32 %v1167_v41, 0.0  ;;  %v2380_v41 = vld [vmem:[%s2777_s8 + $0x30] sm:$0xff]   ;;  %v2381_v42 = vld [vmem:[%s2777_s8 + $0x38] sm:$0xff]  }
 0x123   : > { %v2116_v45 = vpop.f32.mrb[20].mxu1  ;;  %v2053_v46 = vpop.f32.mrb[21].mxu0  ;;  %2226 = vmatprep.subr.bf16.mxu1 %v2380_v41 }
 0x124   : > { %v1206_v48 = vmax.f32 %v1170_v43, 0.0  ;;  %v2054_v49 = vadd.f32 %v2053_v46, %v2052_v44  ;;  %v2117_v50 = vpop.f32.mrb[21].mxu1  ;;  %v2055_v51 = vpop.f32.mrb[22].mxu0  ;;  %2227 = vmatpush3.bf16.msra.mxu1 %v2380_v41  ;;  %v2383_v43 = vld [vmem:[%s2779_s10 + $0x8] sm:$0xff]   ;;  %v2384_v44 = vld [vmem:[%s2779_s10 + $0x10] sm:$0xff]   ;;  %v2386_v46 = vld [vmem:[%s2779_s10 + $0x20] sm:$0xff]  }
 0x125   : > { %v2118_v52 = vadd.f32 %v2117_v50, %v2116_v45  ;;  %v2119_v53 = vpop.f32.mrb[22].mxu1  ;;  %v2056_v54 = vpop.f32.mrb[23].mxu0  ;;  %2228 = vmatprep.subr.bf16.mxu1 %v2381_v42  ;;  %v2385_v45 = vld [vmem:[%s2779_s10 + $0x18] sm:$0xff]  }
 0x126   : > { %v1078_v55 = vadd.f32 %v2054_v49, %v2669_v16  ;;  %v2057_v56 = vadd.f32 %v2056_v54, %v2055_v51  ;;  %v2120_v57 = vpop.f32.mrb[23].mxu1  ;;  %v1234_v58 = vpack.c.bf16 %v1206_v48, %v1205_v47  ;;  %v2387_v47 = vld [vmem:[%s2779_s10 + $0x28] sm:$0xff]   ;;  %v2714_v48 = vld [vmem:[%s2776_s7] ss:$0 sm:$0xff] }
 0x127   : > { %v2121_v59 = vadd.f32 %v2120_v57, %v2119_v53 }
 0x128   : > { %v1175_v60 = vadd.f32 %v2118_v52, %v1078_v55  ;;  %v1081_v61 = vadd.f32 %v2057_v56, %v2669_v16  ;;  %2206 = vmatprep.mubr.bf16.mxu0 %v1234_v58  ;;  %2229 = vmatpush3.bf16.msra.mxu1 %v2381_v42  ;;  %v2388_v42 = vld [vmem:[%s2779_s10 + $0x30] sm:$0xff]  }
 0x12a   : > { %v1178_v62 = vadd.f32 %v2121_v59, %v1081_v61  ;;  %v2058_v63 = vpop.f32.mrb[24].mxu0  ;;  %v1207_v2 = vmax.f32 %v1175_v60, 0.0 }
 0x12b   : > { %v2122_v0 = vpop.f32.mrb[24].mxu1  ;;  %v2059_v1 = vpop.f32.mrb[25].mxu0 }
 0x12c   : > { %v1208_v3 = vmax.f32 %v1178_v62, 0.0  ;;  %v2060_v4 = vadd.f32 %v2059_v1, %v2058_v63  ;;  %v2123_v5 = vpop.f32.mrb[25].mxu1  ;;  %v2061_v6 = vpop.f32.mrb[26].mxu0 }
 0x12d   : > { %v2124_v7 = vadd.f32 %v2123_v5, %v2122_v0  ;;  %v2125_v8 = vpop.f32.mrb[26].mxu1  ;;  %v2062_v9 = vpop.f32.mrb[27].mxu0 }
 0x12e   : > { %v1086_v10 = vadd.f32 %v2060_v4, %v2669_v16  ;;  %v2063_v11 = vadd.f32 %v2062_v9, %v2061_v6  ;;  %v2126_v12 = vpop.f32.mrb[27].mxu1  ;;  %v1235_v13 = vpack.c.bf16 %v1208_v3, %v1207_v2 }
 0x12f   : > { %v2127_v14 = vadd.f32 %v2126_v12, %v2125_v8 }
 0x130   : > { %v1183_v15 = vadd.f32 %v2124_v7, %v1086_v10  ;;  %v1089_v17 = vadd.f32 %v2063_v11, %v2669_v16  ;;  %2207 = vmatmul.mubr.bf16.gmra.mrb[40].mxu0 %v1235_v13 }
 0x132   : > { %v1186_v18 = vadd.f32 %v2127_v14, %v1089_v17  ;;  %v2064_v19 = vpop.f32.mrb[28].mxu0  ;;  %v1209_v22 = vmax.f32 %v1183_v15, 0.0 }
 0x133   : > { %v2128_v20 = vpop.f32.mrb[28].mxu1  ;;  %v2065_v21 = vpop.f32.mrb[29].mxu0 }
 0x134   : > { %v1210_v23 = vmax.f32 %v1186_v18, 0.0  ;;  %v2066_v24 = vadd.f32 %v2065_v21, %v2064_v19  ;;  %v2129_v25 = vpop.f32.mrb[29].mxu1  ;;  %v2067_v26 = vpop.f32.mrb[30].mxu0 }
 0x135   : > { %v2130_v27 = vadd.f32 %v2129_v25, %v2128_v20  ;;  %v2131_v28 = vpop.f32.mrb[30].mxu1  ;;  %v2068_v29 = vpop.f32.mrb[31].mxu0 }
 0x136   : > { %v1094_v30 = vadd.f32 %v2066_v24, %v2669_v16  ;;  %v2069_v31 = vadd.f32 %v2068_v29, %v2067_v26  ;;  %v2132_v32 = vpop.f32.mrb[31].mxu1  ;;  %v1236_v33 = vpack.c.bf16 %v1210_v23, %v1209_v22 }
 0x137   : > { %v2133_v34 = vadd.f32 %v2132_v32, %v2131_v28 }
 0x138   : > { %v1191_v35 = vadd.f32 %v2130_v27, %v1094_v30  ;;  %v1097_v36 = vadd.f32 %v2069_v31, %v2669_v16  ;;  %2210 = vmatprep.mubr.bf16.mxu0 %v1236_v33  ;;  %v2382_v16 = vld [vmem:[%s2779_s10] sm:$0xff]  }
 0x139   : > { %2246 = vmatprep.subr.bf16.mxu0 %v2382_v16  ;;  %2278 = vmatprep.subr.bf16.mxu1 %v2382_v16 }
 0x13a   : > { %v1194_v37 = vadd.f32 %v2133_v34, %v1097_v36  ;;  %v1211_v38 = vmax.f32 %v1191_v35, 0.0  ;;  %2247 = vmatpush3.bf16.msra.mxu0 %v2382_v16 }
 0x13b   : > { %2248 = vmatprep.subr.bf16.mxu0 %v2383_v43 }
 0x13c   : > { %v1212_v39 = vmax.f32 %v1194_v37, 0.0 }
 0x13e   : > { %v1237_v40 = vpack.c.bf16 %v1212_v39, %v1211_v38  ;;  %2249 = vmatpush3.bf16.msra.mxu0 %v2383_v43 }
 0x13f   : > { %2250 = vmatprep.subr.bf16.mxu0 %v2384_v44 }
 0x140   : > { %2211 = vmatmul.mubr.bf16.gmra.mrb[44].mxu0 %v1237_v40 }
 0x142   : > { %2251 = vmatpush3.bf16.msra.mxu0 %v2384_v44 }
 0x143   : > { %2252 = vmatprep.subr.bf16.mxu0 %v2385_v45 }
 0x146   : > { %2253 = vmatpush3.bf16.msra.mxu0 %v2385_v45 }
 0x147   : > { %2254 = vmatprep.subr.bf16.mxu0 %v2386_v46 }
 0x14a   : > { %2255 = vmatpush3.bf16.msra.mxu0 %v2386_v46 }
 0x14b   : > { %2256 = vmatprep.subr.bf16.mxu0 %v2387_v47 }
 0x14e   : > { %2257 = vmatpush3.bf16.msra.mxu0 %v2387_v47 }
 0x14f   : > { %2258 = vmatprep.subr.bf16.mxu0 %v2388_v42 }
 0x152   : > { %2259 = vmatpush3.bf16.msra.mxu0 %v2388_v42 }
 0x1e3   : > { %v2200_v49 = vpop.f32.mrb[32].mxu0 }
 0x1e4   : > { %v1335_v50 = vadd.f32 %v2200_v49, %v2714_v48  ;;  %v1326_v51 = vpop.f32.mrb[33].mxu0 }
 0x1e5   : > { %v1327_v52 = vadd.f32 %v2714_v48, %v1326_v51  ;;  %v2201_v53 = vpop.f32.mrb[34].mxu0 }
 0x1e6   : > { %v1338_v54 = vadd.f32 %v2201_v53, %v2714_v48  ;;  %v1329_v55 = vpop.f32.mrb[35].mxu0  ;;  %v1391_v57 = vmax.f32 %v1335_v50, 0.0 }
 0x1e7   : > { %v1330_v56 = vadd.f32 %v2714_v48, %v1329_v55  ;;  %v1389_v59 = vmax.f32 %v1327_v52, 0.0 }
 0x1e8   : > { %v1392_v58 = vmax.f32 %v1338_v54, 0.0 }
 0x1e9   : > { %v1390_v60 = vmax.f32 %v1330_v56, 0.0 }
 0x1ea   : > { %v1423_v61 = vpack.c.bf16 %v1392_v58, %v1391_v57 }
 0x1eb   : > { %v1422_v62 = vpack.c.bf16 %v1390_v60, %v1389_v59 }
 0x1ed   : > { %2230 = vmatprep.mubr.bf16.mxu1 %v1422_v62 }
 0x1ee   : > { %2231 = vmatmul.mubr.bf16.vlgmr.msra.gmra.mrb[32].mxu1 %v1423_v61 }
 0x1ef   : > { %2286 = vmatpush3.bf16.msra.mxu1 %v2382_v16  ;;  %v2389_v16 = vld [vmem:[%s2779_s10 + $0x38] sm:$0xff]  }
 0x1f0   : > { %2279 = vmatprep.subr.bf16.mxu1 %v2383_v43  ;;  %2260 = vmatprep.subr.bf16.mxu0 %v2389_v16 }
 0x1f1   : > { %2261 = vmatpush3.bf16.msra.mxu0 %v2389_v16 }
 0x1f3   : > { %v2204_v63 = vpop.f32.mrb[36].mxu0  ;;  %2287 = vmatpush3.bf16.msra.mxu1 %v2383_v43  ;;  %v1986_v43 = vld [vmem:[%s2778_s9] ss:$0 sm:$0xff] }
 0x1f4   : > { %v1351_v0 = vadd.f32 %v2204_v63, %v2714_v48  ;;  %v1342_v1 = vpop.f32.mrb[37].mxu0  ;;  %2280 = vmatprep.subr.bf16.mxu1 %v2384_v44 }
 0x1f5   : > { %v1343_v2 = vadd.f32 %v2714_v48, %v1342_v1  ;;  %v2205_v3 = vpop.f32.mrb[38].mxu0 }
 0x1f6   : > { %v1354_v4 = vadd.f32 %v2205_v3, %v2714_v48  ;;  %v1345_v5 = vpop.f32.mrb[39].mxu0  ;;  %v1395_v7 = vmax.f32 %v1351_v0, 0.0 }
 0x1f7   : > { %v1346_v6 = vadd.f32 %v2714_v48, %v1345_v5  ;;  %2288 = vmatpush3.bf16.msra.mxu1 %v2384_v44  ;;  %v1393_v9 = vmax.f32 %v1343_v2, 0.0 }
 0x1f8   : > { %v1396_v8 = vmax.f32 %v1354_v4, 0.0  ;;  %2281 = vmatprep.subr.bf16.mxu1 %v2385_v45 }
 0x1f9   : > { %v1394_v10 = vmax.f32 %v1346_v6, 0.0 }
 0x1fa   : > { %v1425_v11 = vpack.c.bf16 %v1396_v8, %v1395_v7 }
 0x1fb   : > { %v1424_v12 = vpack.c.bf16 %v1394_v10, %v1393_v9  ;;  %2289 = vmatpush3.bf16.msra.mxu1 %v2385_v45 }
 0x1fc   : > { %2282 = vmatprep.subr.bf16.mxu1 %v2386_v46 }
 0x1fd   : > { %2234 = vmatprep.mubr.bf16.mxu1 %v1424_v12 }
 0x1fe   : > { %2235 = vmatmul.mubr.bf16.gmra.mrb[36].mxu1 %v1425_v11 }
 0x1ff   : > { %2290 = vmatpush3.bf16.msra.mxu1 %v2386_v46 }
 0x200   : > { %2283 = vmatprep.subr.bf16.mxu1 %v2387_v47 }
 0x203   : > { %v2208_v13 = vpop.f32.mrb[40].mxu0  ;;  %2291 = vmatpush3.bf16.msra.mxu1 %v2387_v47 }
 0x204   : > { %v1367_v14 = vadd.f32 %v2208_v13, %v2714_v48  ;;  %v1358_v15 = vpop.f32.mrb[41].mxu0  ;;  %2284 = vmatprep.subr.bf16.mxu1 %v2388_v42 }
 0x205   : > { %v1359_v17 = vadd.f32 %v2714_v48, %v1358_v15  ;;  %v2209_v18 = vpop.f32.mrb[42].mxu0 }
 0x206   : > { %v1370_v19 = vadd.f32 %v2209_v18, %v2714_v48  ;;  %v1361_v20 = vpop.f32.mrb[43].mxu0  ;;  %v1399_v22 = vmax.f32 %v1367_v14, 0.0 }
 0x207   : > { %v1362_v21 = vadd.f32 %v2714_v48, %v1361_v20  ;;  %v1397_v24 = vmax.f32 %v1359_v17, 0.0  ;;  %2292 = vmatpush3.bf16.msra.mxu1 %v2388_v42 }
 0x208   : > { %v1400_v23 = vmax.f32 %v1370_v19, 0.0  ;;  %2285 = vmatprep.subr.bf16.mxu1 %v2389_v16 }
 0x209   : > { %v1398_v25 = vmax.f32 %v1362_v21, 0.0 }
 0x20a   : > { %v1427_v26 = vpack.c.bf16 %v1400_v23, %v1399_v22 }
 0x20b   : > { %v1426_v27 = vpack.c.bf16 %v1398_v25, %v1397_v24  ;;  %2293 = vmatpush3.bf16.msra.mxu1 %v2389_v16 }
 0x20d   : > { %2238 = vmatprep.mubr.bf16.mxu1 %v1426_v27 }
 0x20e   : > { %2239 = vmatmul.mubr.bf16.gmra.mrb[40].mxu1 %v1427_v26 }
 0x213   : > { %v2212_v28 = vpop.f32.mrb[44].mxu0 }
 0x214   : > { %v1383_v29 = vadd.f32 %v2212_v28, %v2714_v48  ;;  %v1374_v30 = vpop.f32.mrb[45].mxu0 }
 0x215   : > { %v1375_v31 = vadd.f32 %v2714_v48, %v1374_v30  ;;  %v2213_v32 = vpop.f32.mrb[46].mxu0 }
 0x216   : > { %v1386_v33 = vadd.f32 %v2213_v32, %v2714_v48  ;;  %v1377_v34 = vpop.f32.mrb[47].mxu0  ;;  %v1403_v36 = vmax.f32 %v1383_v29, 0.0 }
 0x217   : > { %v1378_v35 = vadd.f32 %v2714_v48, %v1377_v34  ;;  %v1401_v38 = vmax.f32 %v1375_v31, 0.0 }
 0x218   : > { %v1404_v37 = vmax.f32 %v1386_v33, 0.0 }
 0x219   : > { %v1402_v39 = vmax.f32 %v1378_v35, 0.0 }
 0x21a   : > { %v1429_v40 = vpack.c.bf16 %v1404_v37, %v1403_v36  ;;  %v1995_v37 = vld [vmem:[%s2780_s11] ss:$0 sm:$0xff] }
 0x21b   : > { %v1428_v41 = vpack.c.bf16 %v1402_v39, %v1401_v38 }
 0x21d   : > { %2242 = vmatprep.mubr.bf16.mxu1 %v1428_v41 }
 0x21e   : > { %2243 = vmatmul.mubr.bf16.gmra.mrb[44].mxu1 %v1429_v40 }
 0x2c1   : > { %v2232_v44 = vpop.f32.mrb[32].mxu1 }
 0x2c2   : > { %v1527_v45 = vadd.f32 %v2232_v44, %v1986_v43  ;;  %v1518_v46 = vpop.f32.mrb[33].mxu1 }
 0x2c3   : > { %v1519_v47 = vadd.f32 %v1986_v43, %v1518_v46  ;;  %v2233_v48 = vpop.f32.mrb[34].mxu1 }
 0x2c4   : > { %v1530_v49 = vadd.f32 %v2233_v48, %v1986_v43  ;;  %v1521_v50 = vpop.f32.mrb[35].mxu1  ;;  %v1583_v52 = vmax.f32 %v1527_v45, 0.0 }
 0x2c5   : > { %v1522_v51 = vadd.f32 %v1986_v43, %v1521_v50  ;;  %v1581_v54 = vmax.f32 %v1519_v47, 0.0 }
 0x2c6   : > { %v1584_v53 = vmax.f32 %v1530_v49, 0.0 }
 0x2c7   : > { %v1582_v55 = vmax.f32 %v1522_v51, 0.0 }
 0x2c8   : > { %v1615_v56 = vpack.c.bf16 %v1584_v53, %v1583_v52 }
 0x2c9   : > { %v1614_v57 = vpack.c.bf16 %v1582_v55, %v1581_v54 }
 0x2cb   : > { %2262 = vmatprep.mubr.bf16.mxu0 %v1614_v57 }
 0x2cc   : > { %2263 = vmatmul.mubr.bf16.vlgmr.msra.gmra.mrb[48].mxu0 %v1615_v56 }
 0x2d1   : > { %v2236_v58 = vpop.f32.mrb[36].mxu1 }
 0x2d2   : > { %v1543_v59 = vadd.f32 %v2236_v58, %v1986_v43  ;;  %v1534_v60 = vpop.f32.mrb[37].mxu1 }
 0x2d3   : > { %v1535_v61 = vadd.f32 %v1986_v43, %v1534_v60  ;;  %v2237_v62 = vpop.f32.mrb[38].mxu1 }
 0x2d4   : > { %v1546_v63 = vadd.f32 %v2237_v62, %v1986_v43  ;;  %v1537_v0 = vpop.f32.mrb[39].mxu1  ;;  %v1587_v2 = vmax.f32 %v1543_v59, 0.0 }
 0x2d5   : > { %v1538_v1 = vadd.f32 %v1986_v43, %v1537_v0  ;;  %v1585_v4 = vmax.f32 %v1535_v61, 0.0 }
 0x2d6   : > { %v1588_v3 = vmax.f32 %v1546_v63, 0.0 }
 0x2d7   : > { %v1586_v5 = vmax.f32 %v1538_v1, 0.0 }
 0x2d8   : > { %v1617_v6 = vpack.c.bf16 %v1588_v3, %v1587_v2 }
 0x2d9   : > { %v1616_v7 = vpack.c.bf16 %v1586_v5, %v1585_v4 }
 0x2db   : > { %2266 = vmatprep.mubr.bf16.mxu0 %v1616_v7 }
 0x2dc   : > { %2267 = vmatmul.mubr.bf16.gmra.mrb[52].mxu0 %v1617_v6 }
 0x2e1   : > { %v2240_v8 = vpop.f32.mrb[40].mxu1 }
 0x2e2   : > { %v1559_v9 = vadd.f32 %v2240_v8, %v1986_v43  ;;  %v1550_v10 = vpop.f32.mrb[41].mxu1 }
 0x2e3   : > { %v1551_v11 = vadd.f32 %v1986_v43, %v1550_v10  ;;  %v2241_v12 = vpop.f32.mrb[42].mxu1 }
 0x2e4   : > { %v1562_v13 = vadd.f32 %v2241_v12, %v1986_v43  ;;  %v1553_v14 = vpop.f32.mrb[43].mxu1  ;;  %v1591_v17 = vmax.f32 %v1559_v9, 0.0 }
 0x2e5   : > { %v1554_v15 = vadd.f32 %v1986_v43, %v1553_v14  ;;  %v1589_v19 = vmax.f32 %v1551_v11, 0.0 }
 0x2e6   : > { %v1592_v18 = vmax.f32 %v1562_v13, 0.0 }
 0x2e7   : > { %v1590_v20 = vmax.f32 %v1554_v15, 0.0 }
 0x2e8   : > { %v1619_v21 = vpack.c.bf16 %v1592_v18, %v1591_v17 }
 0x2e9   : > { %v1618_v22 = vpack.c.bf16 %v1590_v20, %v1589_v19 }
 0x2eb   : > { %2270 = vmatprep.mubr.bf16.mxu1 %v1618_v22 }
 0x2ec   : > { %2271 = vmatmul.mubr.bf16.vlgmr.msra.gmra.mrb[48].mxu1 %v1619_v21 }
 0x2f1   : > { %v2244_v23 = vpop.f32.mrb[44].mxu1 }
 0x2f2   : > { %v1575_v24 = vadd.f32 %v2244_v23, %v1986_v43  ;;  %v1566_v25 = vpop.f32.mrb[45].mxu1 }
 0x2f3   : > { %v1567_v26 = vadd.f32 %v1986_v43, %v1566_v25  ;;  %v2245_v27 = vpop.f32.mrb[46].mxu1 }
 0x2f4   : > { %v1578_v28 = vadd.f32 %v2245_v27, %v1986_v43  ;;  %v1569_v29 = vpop.f32.mrb[47].mxu1  ;;  %v1595_v31 = vmax.f32 %v1575_v24, 0.0 }
 0x2f5   : > { %v1570_v30 = vadd.f32 %v1986_v43, %v1569_v29  ;;  %v1593_v33 = vmax.f32 %v1567_v26, 0.0 }
 0x2f6   : > { %v1596_v32 = vmax.f32 %v1578_v28, 0.0 }
 0x2f7   : > { %v1594_v34 = vmax.f32 %v1570_v30, 0.0 }
 0x2f8   : > { %v1621_v35 = vpack.c.bf16 %v1596_v32, %v1595_v31 }
 0x2f9   : > { %v1620_v36 = vpack.c.bf16 %v1594_v34, %v1593_v33 }
 0x2fb   : > { %2274 = vmatprep.mubr.bf16.mxu1 %v1620_v36 }
 0x2fc   : > { %2275 = vmatmul.mubr.bf16.gmra.mrb[52].mxu1 %v1621_v35 }
 0x39f   : > { %v2264_v38 = vpop.f32.mrb[48].mxu0 }
 0x3a0   : > { %v1719_v39 = vadd.f32 %v2264_v38, %v1995_v37  ;;  %v1710_v40 = vpop.f32.mrb[49].mxu0 }
 0x3a1   : > { %v1711_v41 = vadd.f32 %v1995_v37, %v1710_v40  ;;  %v2265_v42 = vpop.f32.mrb[50].mxu0 }
 0x3a2   : > { %v1775_v16 = vmax.f32 %v1719_v39, 0.0  ;;  %v1722_v43 = vadd.f32 %v2265_v42, %v1995_v37  ;;  %v1713_v44 = vpop.f32.mrb[51].mxu0 }
 0x3a3   : > { %v1773_v45 = vmax.f32 %v1711_v41, 0.0  ;;  %v1714_v46 = vadd.f32 %v1995_v37, %v1713_v44 }
 0x3a4   : > { %1791 = vst [vmem:[%s2748_s28 + $0x10] sm:$0xff] %v1775_v16  ;;  %v1776_v47 = vmax.f32 %v1722_v43, 0.0 }
 0x3a5   : > { %1789 = vst [vmem:[%s2748_s28] sm:$0xff] %v1773_v45  ;;  %v1774_v48 = vmax.f32 %v1714_v46, 0.0 }
 0x3a6   : > { %1792 = vst [vmem:[%s2748_s28 + $0x18] sm:$0xff] %v1776_v47 }
 0x3a7   : > { %1790 = vst [vmem:[%s2748_s28 + $0x8] sm:$0xff] %v1774_v48 }
 0x3af   : > { %v2268_v49 = vpop.f32.mrb[52].mxu0 }
 0x3b0   : > { %v1735_v50 = vadd.f32 %v2268_v49, %v1995_v37  ;;  %v1726_v51 = vpop.f32.mrb[53].mxu0 }
 0x3b1   : > { %v1727_v52 = vadd.f32 %v1995_v37, %v1726_v51  ;;  %v2269_v53 = vpop.f32.mrb[54].mxu0 }
 0x3b2   : > { %v1779_v54 = vmax.f32 %v1735_v50, 0.0  ;;  %v1738_v55 = vadd.f32 %v2269_v53, %v1995_v37  ;;  %v1729_v56 = vpop.f32.mrb[55].mxu0 }
 0x3b3   : > { %v1777_v57 = vmax.f32 %v1727_v52, 0.0  ;;  %v1730_v58 = vadd.f32 %v1995_v37, %v1729_v56 }
 0x3b4   : > { %1795 = vst [vmem:[%s2748_s28 + $0x30] sm:$0xff] %v1779_v54  ;;  %v1780_v59 = vmax.f32 %v1738_v55, 0.0 }
 0x3b5   : > { %1793 = vst [vmem:[%s2748_s28 + $0x20] sm:$0xff] %v1777_v57  ;;  %v1778_v60 = vmax.f32 %v1730_v58, 0.0 }
 0x3b6   : > { %1796 = vst [vmem:[%s2748_s28 + $0x38] sm:$0xff] %v1780_v59 }
 0x3b7   : > { %1794 = vst [vmem:[%s2748_s28 + $0x28] sm:$0xff] %v1778_v60 }
 0x3bf   : > { %v2272_v61 = vpop.f32.mrb[48].mxu1 }
 0x3c0   : > { %v1751_v62 = vadd.f32 %v2272_v61, %v1995_v37  ;;  %v1742_v63 = vpop.f32.mrb[49].mxu1 }
 0x3c1   : > { %v1743_v0 = vadd.f32 %v1995_v37, %v1742_v63  ;;  %v2273_v1 = vpop.f32.mrb[50].mxu1 }
 0x3c2   : > { %v1783_v2 = vmax.f32 %v1751_v62, 0.0  ;;  %v1754_v3 = vadd.f32 %v2273_v1, %v1995_v37  ;;  %v1745_v4 = vpop.f32.mrb[51].mxu1 }
 0x3c3   : > { %v1781_v5 = vmax.f32 %v1743_v0, 0.0  ;;  %v1746_v6 = vadd.f32 %v1995_v37, %v1745_v4 }
 0x3c4   : > { %1799 = vst [vmem:[%s2748_s28 + $0x50] sm:$0xff] %v1783_v2  ;;  %v1784_v7 = vmax.f32 %v1754_v3, 0.0 }
 0x3c5   : > { %1797 = vst [vmem:[%s2748_s28 + $0x40] sm:$0xff] %v1781_v5  ;;  %v1782_v8 = vmax.f32 %v1746_v6, 0.0 }
 0x3c6   : > { %1800 = vst [vmem:[%s2748_s28 + $0x58] sm:$0xff] %v1784_v7 }
 0x3c7   : > { %1798 = vst [vmem:[%s2748_s28 + $0x48] sm:$0xff] %v1782_v8 }
 0x3cf   : > { %v2276_v9 = vpop.f32.mrb[52].mxu1 }
 0x3d0   : > { %v1767_v10 = vadd.f32 %v2276_v9, %v1995_v37  ;;  %v1758_v11 = vpop.f32.mrb[53].mxu1 }
 0x3d1   : > { %v1759_v12 = vadd.f32 %v1995_v37, %v1758_v11  ;;  %v2277_v13 = vpop.f32.mrb[54].mxu1 }
 0x3d2   : > { %v1787_v14 = vmax.f32 %v1767_v10, 0.0  ;;  %v1770_v15 = vadd.f32 %v2277_v13, %v1995_v37  ;;  %v1761_v17 = vpop.f32.mrb[55].mxu1 }
 0x3d3   : > { %v1785_v18 = vmax.f32 %v1759_v12, 0.0  ;;  %v1762_v19 = vadd.f32 %v1995_v37, %v1761_v17 }
 0x3d4   : > { %1803 = vst [vmem:[%s2748_s28 + $0x70] sm:$0xff] %v1787_v14  ;;  %v1788_v20 = vmax.f32 %v1770_v15, 0.0 }
 0x3d5   : > { %1801 = vst [vmem:[%s2748_s28 + $0x60] sm:$0xff] %v1785_v18  ;;  %v1786_v21 = vmax.f32 %v1762_v19, 0.0 }
 0x3d6   : > { %1804 = vst [vmem:[%s2748_s28 + $0x78] sm:$0xff] %v1788_v20 }
 0x3d7   : > { %1802 = vst [vmem:[%s2748_s28 + $0x68] sm:$0xff] %v1786_v21 }
 0x3d8 PF: > { %s22_s21 = sadd.s32 1, %s2396_s21  }
 0x3d9   : > { %p19_p4 = scmp.ge.s32.totalorder %s22_s21, 4  }
 0x3db   :  { %21 = sbr.rel (!%p19_p4) target bundleno = 1 (0x1), region = 107 }

</bundles_post_ra>
